<compile_context>
chip_gen: v7x
topology: tpu7x:2x2x1
jax: 0.10.0
libtpu: 0.0.40
codegen_flags: <defaults>
</compile_context>

<pallas_src>
import jax
import jax.numpy as jnp
from jax import lax
from jax.experimental import pallas as pl
from jax.experimental.pallas import tpu as pltpu


def _nlp_kernel(x_ref, qm_ref, wk_ref, bk_ref, wv_ref, bv_ref, mask_ref,
                wo_ref, bo_ref, qlin_ref, wfc_ref, bfc_ref,
                o_ref, m_ref, l_ref, acc_ref):
    # x_ref   : (1, TK, D)   streamed tile of the bag X
    # qm_ref  : (h, Sq, D)   per-head lane-masked, pre-scaled queries (batch independent)
    # wk_ref  : (D, D)       folded fc_k∘in_proj_k weight (acts as x @ wk)
    # bk_ref  : (1, D)       folded key bias
    # wv_ref  : (D, D)       folded fc_v∘in_proj_v weight
    # bv_ref  : (1, D)       folded value bias
    # mask_ref: (h, 1, D)    lane ownership mask per head
    # wo_ref  : (D, D)       mha out_proj weight (transposed)
    # bo_ref  : (1, D)
    # qlin_ref: (Sq, D)      fc_q(S) (residual term, batch independent)
    # wfc_ref : (D, D)       fc_o weight (transposed)
    # bfc_ref : (1, D)
    # o_ref   : (1, Sq, D)   output block, resident across the kv axis
    # m/l_ref : (h, Sq, 1)   online-softmax running max / sum per (head, seed)
    # acc_ref : (Sq, D)      attention numerator accumulator (heads concatenated on lanes)
    kv = pl.program_id(1)
    nheads = qm_ref.shape[0]

    @pl.when(kv == 0)
    def _init():
        m_ref[...] = jnp.full(m_ref.shape, -jnp.inf, m_ref.dtype)
        l_ref[...] = jnp.zeros(l_ref.shape, l_ref.dtype)
        acc_ref[...] = jnp.zeros(acc_ref.shape, acc_ref.dtype)

    x = x_ref[0]                                                       # (TK, D)
    # Folded projections: one MXU matmul for keys, one for values (instead of 2 each).
    k = jnp.dot(x, wk_ref[...], preferred_element_type=jnp.float32) + bk_ref[...]
    v = jnp.dot(x, wv_ref[...], preferred_element_type=jnp.float32) + bv_ref[...]

    for hh in range(nheads):                                           # small static unroll
        q_h = qm_ref[hh]                                               # (Sq, D) masked+scaled
        mask = mask_ref[hh]                                            # (1, D)
        # Full-D contraction; foreign-head lanes of q are zero, so this equals the
        # per-head (Sq, hd) x (hd, TK) score without slicing the big k tile.
        s = lax.dot_general(q_h, k, (((1,), (1,)), ((), ())),
                            preferred_element_type=jnp.float32)        # (Sq, TK)
        m_prev = m_ref[hh]                                             # (Sq, 1)
        l_prev = l_ref[hh]
        m_new = jnp.maximum(m_prev, s.max(axis=-1, keepdims=True))
        alpha = jnp.exp(m_prev - m_new)
        p = jnp.exp(s - m_new)
        l_ref[hh] = alpha * l_prev + p.sum(axis=-1, keepdims=True)
        m_ref[hh] = m_new
        pv = jnp.dot(p, v, preferred_element_type=jnp.float32)         # (Sq, D)
        # Rescale + accumulate only on this head's lanes; other lanes untouched.
        acc_ref[...] = acc_ref[...] * ((alpha - 1.0) * mask + 1.0) + pv * mask

    @pl.when(kv == pl.num_programs(1) - 1)
    def _finalize():
        # Per-lane softmax denominator = running sum of the head that owns the lane.
        l_full = jnp.zeros(acc_ref.shape, jnp.float32)
        for hh in range(nheads):
            l_full = l_full + l_ref[hh] * mask_ref[hh]
        attn = acc_ref[...] / l_full                                   # heads concat on lanes
        # mha out_proj, + fc_q(S) residual, + relu(fc_o(.)) residual, all fused here.
        a = jnp.dot(attn, wo_ref[...], preferred_element_type=jnp.float32) + bo_ref[...]
        o1 = qlin_ref[...].astype(jnp.float32) + a
        ff = jnp.dot(o1, wfc_ref[...], preferred_element_type=jnp.float32) + bfc_ref[...]
        o_ref[0] = (o1 + jnp.maximum(ff, 0.0)).astype(o_ref.dtype)


def _pick_kv_tile(n):
    for tk in (128, 256, 512):
        if n % tk == 0:
            return tk
    # TODO(synk): ragged bag sizes (N not a multiple of a nice tile) fall back to a single
    # tile; proper handling would pad X and mask padded keys with -inf scores.
    return n


def nlp_forward(X, params, num_heads):
    """Equivalent of NLP.forward(X) with ln=False.  X: (B, N, D) -> (B, num_seeds, D)."""
    # TODO(synk): ln=True (LayerNorm) branch of MultiHeadAttention not implemented
    # in-kernel (NLP default is ln=False); gated path is never used by NLP.
    S, wq, bq, wk, bk, wv, bv, in_w, in_b, op_w, op_b, fco_w, fco_b = params
    B, N, D = X.shape
    Sq = S.shape[1]
    h = num_heads
    assert D % h == 0, "embed dim must be divisible by num_heads"
    hd = D // h
    f32 = jnp.float32
    hi = lax.Precision.HIGHEST

    wq_in, wk_in, wv_in = in_w[:D], in_w[D:2 * D], in_w[2 * D:]
    bq_in, bk_in, bv_in = in_b[:D], in_b[D:2 * D], in_b[2 * D:]

    # ---- host-side weight folding (cheap DxD matmuls, done once) ----
    # Query path: fc_q(S) (needed for the residual), then mha q in-proj + 1/sqrt(hd) scale.
    q_lin = jnp.dot(S[0].astype(f32), wq.T, precision=hi) + bq                  # (Sq, D)
    q_scaled = (jnp.dot(q_lin, wq_in.T, precision=hi) + bq_in) * (hd ** -0.5)   # (Sq, D)
    # Key/value paths: fc_{k,v} followed by mha in-proj folded into one effective matmul.
    wk_eff = jnp.dot(wk_in, wk, precision=hi).T                                 # x @ wk_eff
    bk_eff = (jnp.dot(wk_in, bk, precision=hi) + bk_in)[None, :]
    wv_eff = jnp.dot(wv_in, wv, precision=hi).T
    bv_eff = (jnp.dot(wv_in, bv, precision=hi) + bv_in)[None, :]

    # Per-head lane masks: head hh owns channels [hh*hd, (hh+1)*hd).
    head_mask = (jnp.arange(D)[None, :] // hd == jnp.arange(h)[:, None]).astype(f32)
    q_masked = q_scaled[None, :, :] * head_mask[:, None, :]                     # (h, Sq, D)
    head_mask3 = head_mask[:, None, :]                                          # (h, 1, D)

    tk = _pick_kv_tile(N)
    nkv = N // tk

    cost = pl.CostEstimate(
        flops=4 * B * N * D * D + 4 * B * h * Sq * N * D,
        transcendentals=B * h * Sq * N,
        bytes_accessed=X.size * X.dtype.itemsize + 4 * D * D * 4 + B * Sq * D * 4)

    return pl.pallas_call(
        _nlp_kernel,
        out_shape=jax.ShapeDtypeStruct((B, Sq, D), X.dtype),
        grid_spec=pltpu.PrefetchScalarGridSpec(
            num_scalar_prefetch=0,
            grid=(B, nkv),
            in_specs=[
                pl.BlockSpec((1, tk, D), lambda b, j: (b, j, 0)),     # X tile (streamed)
                pl.BlockSpec((h, Sq, D), lambda b, j: (0, 0, 0)),     # masked/scaled queries
                pl.BlockSpec((D, D), lambda b, j: (0, 0)),            # folded key weight
                pl.BlockSpec((1, D), lambda b, j: (0, 0)),            # folded key bias
                pl.BlockSpec((D, D), lambda b, j: (0, 0)),            # folded value weight
                pl.BlockSpec((1, D), lambda b, j: (0, 0)),            # folded value bias
                pl.BlockSpec((h, 1, D), lambda b, j: (0, 0, 0)),      # head lane masks
                pl.BlockSpec((D, D), lambda b, j: (0, 0)),            # mha out_proj weight^T
                pl.BlockSpec((1, D), lambda b, j: (0, 0)),            # mha out_proj bias
                pl.BlockSpec((Sq, D), lambda b, j: (0, 0)),           # fc_q(S) residual
                pl.BlockSpec((D, D), lambda b, j: (0, 0)),            # fc_o weight^T
                pl.BlockSpec((1, D), lambda b, j: (0, 0)),            # fc_o bias
            ],
            out_specs=pl.BlockSpec((1, Sq, D), lambda b, j: (b, 0, 0)),
            scratch_shapes=[
                pltpu.VMEM((h, Sq, 1), jnp.float32),   # running max per (head, seed)
                pltpu.VMEM((h, Sq, 1), jnp.float32),   # running sum per (head, seed)
                pltpu.VMEM((Sq, D), jnp.float32),      # attention numerator accumulator
            ]),
        compiler_params=pltpu.CompilerParams(
            dimension_semantics=("parallel", "arbitrary")),
        cost_estimate=cost,
    )(X, q_masked, wk_eff, bk_eff, wv_eff, bv_eff, head_mask3,
      op_w.T, op_b[None, :], q_lin, fco_w.T, fco_b[None, :])


# ----------------------------- reference (pure JAX) -----------------------------
def ref_nlp(X, params, num_heads):
    S, wq, bq, wk, bk, wv, bv, in_w, in_b, op_w, op_b, fco_w, fco_b = params
    B, N, D = X.shape
    Sq = S.shape[1]
    h = num_heads
    hd = D // h
    ge = jnp.broadcast_to(S, (B, Sq, D))
    Q = ge @ wq.T + bq
    K = X @ wk.T + bk
    V = X @ wv.T + bv
    q = Q @ in_w[:D].T + in_b[:D]
    k = K @ in_w[D:2 * D].T + in_b[D:2 * D]
    v = V @ in_w[2 * D:].T + in_b[2 * D:]
    qh = q.reshape(B, Sq, h, hd)
    kh = k.reshape(B, N, h, hd)
    vh = v.reshape(B, N, h, hd)
    logits = jnp.einsum('bqhd,bkhd->bhqk', qh, kh) * (hd ** -0.5)
    attn = jax.nn.softmax(logits, axis=-1)
    ctx = jnp.einsum('bhqk,bkhd->bqhd', attn, vh).reshape(B, Sq, D)
    A = ctx @ op_w.T + op_b
    O = Q + A
    O = O + jax.nn.relu(O @ fco_w.T + fco_b)
    return O


if __name__ == "__main__":
    # Small shapes consistent with the module: dim divisible by num_heads, lane-dense D.
    B, N, D, H_HEADS, SEEDS = 2, 256, 128, 4, 8

    key = jax.random.PRNGKey(0)
    ks = jax.random.split(key, 14)

    def rnd(k, shape, scale=0.05):
        return jax.random.normal(k, shape, dtype=jnp.float32) * scale

    X = jax.random.normal(ks[0], (B, N, D), dtype=jnp.float32)
    S = rnd(ks[1], (1, SEEDS, D), 0.2)
    wq, bq = rnd(ks[2], (D, D)), rnd(ks[3], (D,))
    wk, bk = rnd(ks[4], (D, D)), rnd(ks[5], (D,))
    wv, bv = rnd(ks[6], (D, D)), rnd(ks[7], (D,))
    in_w, in_b = rnd(ks[8], (3 * D, D)), rnd(ks[9], (3 * D,))
    op_w, op_b = rnd(ks[10], (D, D)), rnd(ks[11], (D,))
    fco_w, fco_b = rnd(ks[12], (D, D)), rnd(ks[13], (D,))
    params = (S, wq, bq, wk, bk, wv, bv, in_w, in_b, op_w, op_b, fco_w, fco_b)

    out = jax.block_until_ready(nlp_forward(X, params, H_HEADS))

    with jax.default_matmul_precision("highest"):
        ref = jax.block_until_ready(ref_nlp(X, params, H_HEADS))

    assert out.shape == (B, SEEDS, D), out.shape
    # Tolerance covers MXU f32 multi-pass vs XLA reference precision differences;
    # any semantic error (head mapping, bias folds, softmax) would be orders larger.
    max_err = float(jnp.max(jnp.abs(out - ref)))
    assert jnp.allclose(out, ref, rtol=5e-3, atol=5e-3), max_err

    print("KERNEL_OK")
</pallas_src>

<mosaic_0001>
module attributes {stable_mosaic.version = 11 : i64} {
  func.func @_nlp_kernel(%arg0: i32, %arg1: i32, %arg2: memref<1x128x128xf32, #tpu.memory_space<vmem>>, %arg3: memref<4x8x128xf32, #tpu.memory_space<vmem>>, %arg4: memref<128x128xf32, #tpu.memory_space<vmem>>, %arg5: memref<1x128xf32, #tpu.memory_space<vmem>>, %arg6: memref<128x128xf32, #tpu.memory_space<vmem>>, %arg7: memref<1x128xf32, #tpu.memory_space<vmem>>, %arg8: memref<4x1x128xf32, #tpu.memory_space<vmem>>, %arg9: memref<128x128xf32, #tpu.memory_space<vmem>>, %arg10: memref<1x128xf32, #tpu.memory_space<vmem>>, %arg11: memref<8x128xf32, #tpu.memory_space<vmem>>, %arg12: memref<128x128xf32, #tpu.memory_space<vmem>>, %arg13: memref<1x128xf32, #tpu.memory_space<vmem>>, %arg14: memref<1x8x128xf32, #tpu.memory_space<vmem>>, %arg15: memref<4x8x1xf32, #tpu.memory_space<vmem>>, %arg16: memref<4x8x1xf32, #tpu.memory_space<vmem>>, %arg17: memref<8x128xf32, #tpu.memory_space<vmem>>) attributes {dimension_semantics = [#tpu.dimension_semantics<parallel>, #tpu.dimension_semantics<arbitrary>], iteration_bounds = array<i64: 2, 2>, scalar_prefetch = 0 : i64, scratch_operands = 3 : i64, tpu.core_type = #tpu.core_type<tc>, window_params = [{transform_indices = @transform_0, window_bounds = array<i64: 1, 128, 128>}, {pipeline_mode = #tpu.pipeline_mode<synchronous>, transform_indices = @transform_1, window_bounds = array<i64: 4, 8, 128>}, {pipeline_mode = #tpu.pipeline_mode<synchronous>, transform_indices = @transform_2, window_bounds = array<i64: 128, 128>}, {pipeline_mode = #tpu.pipeline_mode<synchronous>, transform_indices = @transform_3, window_bounds = array<i64: 1, 128>}, {pipeline_mode = #tpu.pipeline_mode<synchronous>, transform_indices = @transform_4, window_bounds = array<i64: 128, 128>}, {pipeline_mode = #tpu.pipeline_mode<synchronous>, transform_indices = @transform_5, window_bounds = array<i64: 1, 128>}, {pipeline_mode = #tpu.pipeline_mode<synchronous>, transform_indices = @transform_6, window_bounds = array<i64: 4, 1, 128>}, {pipeline_mode = #tpu.pipeline_mode<synchronous>, transform_indices = @transform_7, window_bounds = array<i64: 128, 128>}, {pipeline_mode = #tpu.pipeline_mode<synchronous>, transform_indices = @transform_8, window_bounds = array<i64: 1, 128>}, {pipeline_mode = #tpu.pipeline_mode<synchronous>, transform_indices = @transform_9, window_bounds = array<i64: 8, 128>}, {pipeline_mode = #tpu.pipeline_mode<synchronous>, transform_indices = @transform_10, window_bounds = array<i64: 128, 128>}, {pipeline_mode = #tpu.pipeline_mode<synchronous>, transform_indices = @transform_11, window_bounds = array<i64: 1, 128>}, {transform_indices = @transform_12, window_bounds = array<i64: 1, 8, 128>}]} {
    %c0_i32 = arith.constant 0 : i32
    %0 = arith.cmpi eq, %arg1, %c0_i32 : i32
    %1 = arith.extui %0 : i1 to i32
    %c0_i32_0 = arith.constant 0 : i32
    %2 = arith.cmpi ne, %1, %c0_i32_0 : i32
    scf.if %2 {
      %cst_122 = arith.constant 0xFF800000 : f32
      %182 = vector.broadcast %cst_122 : f32 to vector<4x8x1xf32>
      %c0_123 = arith.constant 0 : index
      %c0_124 = arith.constant 0 : index
      %c0_125 = arith.constant 0 : index
      %183 = vector.load %arg15[%c0_123, %c0_124, %c0_125] : memref<4x8x1xf32, #tpu.memory_space<vmem>>, vector<4x8x1xf32>
      tpu.vector_store %arg15[%c0_123, %c0_124, %c0_125], %182 {strides = array<i32>} : memref<4x8x1xf32, #tpu.memory_space<vmem>>, vector<4x8x1xf32>,
      %cst_126 = arith.constant 0.000000e+00 : f32
      %184 = vector.broadcast %cst_126 : f32 to vector<4x8x1xf32>
      %c0_127 = arith.constant 0 : index
      %c0_128 = arith.constant 0 : index
      %c0_129 = arith.constant 0 : index
      %185 = vector.load %arg16[%c0_127, %c0_128, %c0_129] : memref<4x8x1xf32, #tpu.memory_space<vmem>>, vector<4x8x1xf32>
      tpu.vector_store %arg16[%c0_127, %c0_128, %c0_129], %184 {strides = array<i32>} : memref<4x8x1xf32, #tpu.memory_space<vmem>>, vector<4x8x1xf32>,
      %cst_130 = arith.constant 0.000000e+00 : f32
      %186 = vector.broadcast %cst_130 : f32 to vector<8x128xf32>
      %c0_131 = arith.constant 0 : index
      %c0_132 = arith.constant 0 : index
      %187 = vector.load %arg17[%c0_131, %c0_132] : memref<8x128xf32, #tpu.memory_space<vmem>>, vector<8x128xf32>
      tpu.vector_store %arg17[%c0_131, %c0_132], %186 {strides = array<i32>} : memref<8x128xf32, #tpu.memory_space<vmem>>, vector<8x128xf32>,
    } else {
    }
    %c0 = arith.constant 0 : index
    %c0_1 = arith.constant 0 : index
    %c0_2 = arith.constant 0 : index
    %3 = vector.load %arg2[%c0, %c0_1, %c0_2] : memref<1x128x128xf32, #tpu.memory_space<vmem>>, vector<1x128x128xf32>
    %4 = vector.shape_cast %3 : vector<1x128x128xf32> to vector<128x128xf32>
    %c0_3 = arith.constant 0 : index
    %c0_4 = arith.constant 0 : index
    %5 = vector.load %arg4[%c0_3, %c0_4] : memref<128x128xf32, #tpu.memory_space<vmem>>, vector<128x128xf32>
    %cst = arith.constant dense<0.000000e+00> : vector<128x128xf32>
    %6 = tpu.matmul %4, %5, %cst {dimension_numbers = #tpu.dot_dimension_numbers<[1], [0], [0], [1], [0, 0, 1, 1], [], []>} : vector<128x128xf32>, vector<128x128xf32>, vector<128x128xf32> -> vector<128x128xf32>
    %c0_5 = arith.constant 0 : index
    %c0_6 = arith.constant 0 : index
    %7 = vector.load %arg5[%c0_5, %c0_6] : memref<1x128xf32, #tpu.memory_space<vmem>>, vector<1x128xf32>
    %8 = vector.broadcast %7 : vector<1x128xf32> to vector<128x128xf32>
    %9 = arith.addf %6, %8 : vector<128x128xf32>
    %c0_7 = arith.constant 0 : index
    %c0_8 = arith.constant 0 : index
    %10 = vector.load %arg6[%c0_7, %c0_8] : memref<128x128xf32, #tpu.memory_space<vmem>>, vector<128x128xf32>
    %cst_9 = arith.constant dense<0.000000e+00> : vector<128x128xf32>
    %11 = tpu.matmul %4, %10, %cst_9 {dimension_numbers = #tpu.dot_dimension_numbers<[1], [0], [0], [1], [0, 0, 1, 1], [], []>} : vector<128x128xf32>, vector<128x128xf32>, vector<128x128xf32> -> vector<128x128xf32>
    %c0_10 = arith.constant 0 : index
    %c0_11 = arith.constant 0 : index
    %12 = vector.load %arg7[%c0_10, %c0_11] : memref<1x128xf32, #tpu.memory_space<vmem>>, vector<1x128xf32>
    %13 = vector.broadcast %12 : vector<1x128xf32> to vector<128x128xf32>
    %14 = arith.addf %11, %13 : vector<128x128xf32>
    %c0_12 = arith.constant 0 : index
    %c0_13 = arith.constant 0 : index
    %c0_14 = arith.constant 0 : index
    %15 = vector.load %arg3[%c0_12, %c0_13, %c0_14] : memref<4x8x128xf32, #tpu.memory_space<vmem>>, vector<1x8x128xf32>
    %16 = vector.shape_cast %15 : vector<1x8x128xf32> to vector<8x128xf32>
    %c0_15 = arith.constant 0 : index
    %c0_16 = arith.constant 0 : index
    %c0_17 = arith.constant 0 : index
    %17 = vector.load %arg8[%c0_15, %c0_16, %c0_17] : memref<4x1x128xf32, #tpu.memory_space<vmem>>, vector<1x1x128xf32>
    %18 = vector.shape_cast %17 : vector<1x1x128xf32> to vector<1x128xf32>
    %cst_18 = arith.constant dense<0.000000e+00> : vector<8x128xf32>
    %19 = tpu.matmul %16, %9, %cst_18 {dimension_numbers = #tpu.dot_dimension_numbers<[1], [1], [0], [0], [0, 0, 1, 0], [], []>} : vector<8x128xf32>, vector<128x128xf32>, vector<8x128xf32> -> vector<8x128xf32>
    %c0_19 = arith.constant 0 : index
    %c0_20 = arith.constant 0 : index
    %c0_21 = arith.constant 0 : index
    %20 = vector.load %arg15[%c0_19, %c0_20, %c0_21] : memref<4x8x1xf32, #tpu.memory_space<vmem>>, vector<1x8x1xf32>
    %21 = vector.shape_cast %20 : vector<1x8x1xf32> to vector<8x1xf32>
    %c0_22 = arith.constant 0 : index
    %c0_23 = arith.constant 0 : index
    %c0_24 = arith.constant 0 : index
    %22 = vector.load %arg16[%c0_22, %c0_23, %c0_24] : memref<4x8x1xf32, #tpu.memory_space<vmem>>, vector<1x8x1xf32>
    %23 = vector.shape_cast %22 : vector<1x8x1xf32> to vector<8x1xf32>
    %cst_25 = arith.constant dense<0xFF800000> : vector<8xf32>
    %24 = vector.multi_reduction <maximumf>, %19, %cst_25 [1] : vector<8x128xf32> to vector<8xf32>
    %25 = vector.shape_cast %24 : vector<8xf32> to vector<8x1xf32>
    %26 = arith.maximumf %21, %25 : vector<8x1xf32>
    %27 = arith.subf %21, %26 : vector<8x1xf32>
    %28 = math.exp %27 : vector<8x1xf32>
    %29 = vector.broadcast %26 : vector<8x1xf32> to vector<8x128xf32>
    %30 = arith.subf %19, %29 : vector<8x128xf32>
    %31 = math.exp %30 : vector<8x128xf32>
    %32 = arith.mulf %28, %23 : vector<8x1xf32>
    %cst_26 = arith.constant dense<0.000000e+00> : vector<8xf32>
    %33 = vector.multi_reduction <add>, %31, %cst_26 [1] : vector<8x128xf32> to vector<8xf32>
    %34 = vector.shape_cast %33 : vector<8xf32> to vector<8x1xf32>
    %35 = arith.addf %32, %34 : vector<8x1xf32>
    %c0_27 = arith.constant 0 : index
    %c0_28 = arith.constant 0 : index
    %c0_29 = arith.constant 0 : index
    %36 = vector.load %arg16[%c0_27, %c0_28, %c0_29] : memref<4x8x1xf32, #tpu.memory_space<vmem>>, vector<1x8x1xf32>
    %37 = vector.shape_cast %36 : vector<1x8x1xf32> to vector<8x1xf32>
    %38 = vector.shape_cast %35 : vector<8x1xf32> to vector<1x8x1xf32>
    tpu.vector_store %arg16[%c0_27, %c0_28, %c0_29], %38 {strides = array<i32>} : memref<4x8x1xf32, #tpu.memory_space<vmem>>, vector<1x8x1xf32>,
    %c0_30 = arith.constant 0 : index
    %c0_31 = arith.constant 0 : index
    %c0_32 = arith.constant 0 : index
    %39 = vector.load %arg15[%c0_30, %c0_31, %c0_32] : memref<4x8x1xf32, #tpu.memory_space<vmem>>, vector<1x8x1xf32>
    %40 = vector.shape_cast %39 : vector<1x8x1xf32> to vector<8x1xf32>
    %41 = vector.shape_cast %26 : vector<8x1xf32> to vector<1x8x1xf32>
    tpu.vector_store %arg15[%c0_30, %c0_31, %c0_32], %41 {strides = array<i32>} : memref<4x8x1xf32, #tpu.memory_space<vmem>>, vector<1x8x1xf32>,
    %cst_33 = arith.constant dense<0.000000e+00> : vector<8x128xf32>
    %42 = tpu.matmul %31, %14, %cst_33 {dimension_numbers = #tpu.dot_dimension_numbers<[1], [0], [0], [1], [0, 0, 1, 1], [], []>} : vector<8x128xf32>, vector<128x128xf32>, vector<8x128xf32> -> vector<8x128xf32>
    %c0_34 = arith.constant 0 : index
    %c0_35 = arith.constant 0 : index
    %43 = vector.load %arg17[%c0_34, %c0_35] : memref<8x128xf32, #tpu.memory_space<vmem>>, vector<8x128xf32>
    %cst_36 = arith.constant 1.000000e+00 : f32
    %44 = vector.broadcast %cst_36 : f32 to vector<8x1xf32>
    %45 = arith.subf %28, %44 : vector<8x1xf32>
    %46 = vector.broadcast %45 : vector<8x1xf32> to vector<8x128xf32>
    %47 = vector.broadcast %18 : vector<1x128xf32> to vector<8x128xf32>
    %48 = arith.mulf %46, %47 : vector<8x128xf32>
    %cst_37 = arith.constant 1.000000e+00 : f32
    %49 = vector.broadcast %cst_37 : f32 to vector<8x128xf32>
    %50 = arith.addf %48, %49 : vector<8x128xf32>
    %51 = arith.mulf %43, %50 : vector<8x128xf32>
    %52 = vector.broadcast %18 : vector<1x128xf32> to vector<8x128xf32>
    %53 = arith.mulf %42, %52 : vector<8x128xf32>
    %54 = arith.addf %51, %53 : vector<8x128xf32>
    %c0_38 = arith.constant 0 : index
    %c0_39 = arith.constant 0 : index
    %55 = vector.load %arg17[%c0_38, %c0_39] : memref<8x128xf32, #tpu.memory_space<vmem>>, vector<8x128xf32>
    tpu.vector_store %arg17[%c0_38, %c0_39], %54 {strides = array<i32>} : memref<8x128xf32, #tpu.memory_space<vmem>>, vector<8x128xf32>,
    %c1 = arith.constant 1 : index
    %c0_40 = arith.constant 0 : index
    %c0_41 = arith.constant 0 : index
    %56 = vector.load %arg3[%c1, %c0_40, %c0_41] : memref<4x8x128xf32, #tpu.memory_space<vmem>>, vector<1x8x128xf32>
    %57 = vector.shape_cast %56 : vector<1x8x128xf32> to vector<8x128xf32>
    %c1_42 = arith.constant 1 : index
    %c0_43 = arith.constant 0 : index
    %c0_44 = arith.constant 0 : index
    %58 = vector.load %arg8[%c1_42, %c0_43, %c0_44] : memref<4x1x128xf32, #tpu.memory_space<vmem>>, vector<1x1x128xf32>
    %59 = vector.shape_cast %58 : vector<1x1x128xf32> to vector<1x128xf32>
    %cst_45 = arith.constant dense<0.000000e+00> : vector<8x128xf32>
    %60 = tpu.matmul %57, %9, %cst_45 {dimension_numbers = #tpu.dot_dimension_numbers<[1], [1], [0], [0], [0, 0, 1, 0], [], []>} : vector<8x128xf32>, vector<128x128xf32>, vector<8x128xf32> -> vector<8x128xf32>
    %c1_46 = arith.constant 1 : index
    %c0_47 = arith.constant 0 : index
    %c0_48 = arith.constant 0 : index
    %61 = vector.load %arg15[%c1_46, %c0_47, %c0_48] : memref<4x8x1xf32, #tpu.memory_space<vmem>>, vector<1x8x1xf32>
    %62 = vector.shape_cast %61 : vector<1x8x1xf32> to vector<8x1xf32>
    %c1_49 = arith.constant 1 : index
    %c0_50 = arith.constant 0 : index
    %c0_51 = arith.constant 0 : index
    %63 = vector.load %arg16[%c1_49, %c0_50, %c0_51] : memref<4x8x1xf32, #tpu.memory_space<vmem>>, vector<1x8x1xf32>
    %64 = vector.shape_cast %63 : vector<1x8x1xf32> to vector<8x1xf32>
    %cst_52 = arith.constant dense<0xFF800000> : vector<8xf32>
    %65 = vector.multi_reduction <maximumf>, %60, %cst_52 [1] : vector<8x128xf32> to vector<8xf32>
    %66 = vector.shape_cast %65 : vector<8xf32> to vector<8x1xf32>
    %67 = arith.maximumf %62, %66 : vector<8x1xf32>
    %68 = arith.subf %62, %67 : vector<8x1xf32>
    %69 = math.exp %68 : vector<8x1xf32>
    %70 = vector.broadcast %67 : vector<8x1xf32> to vector<8x128xf32>
    %71 = arith.subf %60, %70 : vector<8x128xf32>
    %72 = math.exp %71 : vector<8x128xf32>
    %73 = arith.mulf %69, %64 : vector<8x1xf32>
    %cst_53 = arith.constant dense<0.000000e+00> : vector<8xf32>
    %74 = vector.multi_reduction <add>, %72, %cst_53 [1] : vector<8x128xf32> to vector<8xf32>
    %75 = vector.shape_cast %74 : vector<8xf32> to vector<8x1xf32>
    %76 = arith.addf %73, %75 : vector<8x1xf32>
    %c1_54 = arith.constant 1 : index
    %c0_55 = arith.constant 0 : index
    %c0_56 = arith.constant 0 : index
    %77 = vector.load %arg16[%c1_54, %c0_55, %c0_56] : memref<4x8x1xf32, #tpu.memory_space<vmem>>, vector<1x8x1xf32>
    %78 = vector.shape_cast %77 : vector<1x8x1xf32> to vector<8x1xf32>
    %79 = vector.shape_cast %76 : vector<8x1xf32> to vector<1x8x1xf32>
    tpu.vector_store %arg16[%c1_54, %c0_55, %c0_56], %79 {strides = array<i32>} : memref<4x8x1xf32, #tpu.memory_space<vmem>>, vector<1x8x1xf32>,
    %c1_57 = arith.constant 1 : index
    %c0_58 = arith.constant 0 : index
    %c0_59 = arith.constant 0 : index
    %80 = vector.load %arg15[%c1_57, %c0_58, %c0_59] : memref<4x8x1xf32, #tpu.memory_space<vmem>>, vector<1x8x1xf32>
    %81 = vector.shape_cast %80 : vector<1x8x1xf32> to vector<8x1xf32>
    %82 = vector.shape_cast %67 : vector<8x1xf32> to vector<1x8x1xf32>
    tpu.vector_store %arg15[%c1_57, %c0_58, %c0_59], %82 {strides = array<i32>} : memref<4x8x1xf32, #tpu.memory_space<vmem>>, vector<1x8x1xf32>,
    %cst_60 = arith.constant dense<0.000000e+00> : vector<8x128xf32>
    %83 = tpu.matmul %72, %14, %cst_60 {dimension_numbers = #tpu.dot_dimension_numbers<[1], [0], [0], [1], [0, 0, 1, 1], [], []>} : vector<8x128xf32>, vector<128x128xf32>, vector<8x128xf32> -> vector<8x128xf32>
    %c0_61 = arith.constant 0 : index
    %c0_62 = arith.constant 0 : index
    %84 = vector.load %arg17[%c0_61, %c0_62] : memref<8x128xf32, #tpu.memory_space<vmem>>, vector<8x128xf32>
    %cst_63 = arith.constant 1.000000e+00 : f32
    %85 = vector.broadcast %cst_63 : f32 to vector<8x1xf32>
    %86 = arith.subf %69, %85 : vector<8x1xf32>
    %87 = vector.broadcast %86 : vector<8x1xf32> to vector<8x128xf32>
    %88 = vector.broadcast %59 : vector<1x128xf32> to vector<8x128xf32>
    %89 = arith.mulf %87, %88 : vector<8x128xf32>
    %cst_64 = arith.constant 1.000000e+00 : f32
    %90 = vector.broadcast %cst_64 : f32 to vector<8x128xf32>
    %91 = arith.addf %89, %90 : vector<8x128xf32>
    %92 = arith.mulf %84, %91 : vector<8x128xf32>
    %93 = vector.broadcast %59 : vector<1x128xf32> to vector<8x128xf32>
    %94 = arith.mulf %83, %93 : vector<8x128xf32>
    %95 = arith.addf %92, %94 : vector<8x128xf32>
    %c0_65 = arith.constant 0 : index
    %c0_66 = arith.constant 0 : index
    %96 = vector.load %arg17[%c0_65, %c0_66] : memref<8x128xf32, #tpu.memory_space<vmem>>, vector<8x128xf32>
    tpu.vector_store %arg17[%c0_65, %c0_66], %95 {strides = array<i32>} : memref<8x128xf32, #tpu.memory_space<vmem>>, vector<8x128xf32>,
    %c2 = arith.constant 2 : index
    %c0_67 = arith.constant 0 : index
    %c0_68 = arith.constant 0 : index
    %97 = vector.load %arg3[%c2, %c0_67, %c0_68] : memref<4x8x128xf32, #tpu.memory_space<vmem>>, vector<1x8x128xf32>
    %98 = vector.shape_cast %97 : vector<1x8x128xf32> to vector<8x128xf32>
    %c2_69 = arith.constant 2 : index
    %c0_70 = arith.constant 0 : index
    %c0_71 = arith.constant 0 : index
    %99 = vector.load %arg8[%c2_69, %c0_70, %c0_71] : memref<4x1x128xf32, #tpu.memory_space<vmem>>, vector<1x1x128xf32>
    %100 = vector.shape_cast %99 : vector<1x1x128xf32> to vector<1x128xf32>
    %cst_72 = arith.constant dense<0.000000e+00> : vector<8x128xf32>
    %101 = tpu.matmul %98, %9, %cst_72 {dimension_numbers = #tpu.dot_dimension_numbers<[1], [1], [0], [0], [0, 0, 1, 0], [], []>} : vector<8x128xf32>, vector<128x128xf32>, vector<8x128xf32> -> vector<8x128xf32>
    %c2_73 = arith.constant 2 : index
    %c0_74 = arith.constant 0 : index
    %c0_75 = arith.constant 0 : index
    %102 = vector.load %arg15[%c2_73, %c0_74, %c0_75] : memref<4x8x1xf32, #tpu.memory_space<vmem>>, vector<1x8x1xf32>
    %103 = vector.shape_cast %102 : vector<1x8x1xf32> to vector<8x1xf32>
    %c2_76 = arith.constant 2 : index
    %c0_77 = arith.constant 0 : index
    %c0_78 = arith.constant 0 : index
    %104 = vector.load %arg16[%c2_76, %c0_77, %c0_78] : memref<4x8x1xf32, #tpu.memory_space<vmem>>, vector<1x8x1xf32>
    %105 = vector.shape_cast %104 : vector<1x8x1xf32> to vector<8x1xf32>
    %cst_79 = arith.constant dense<0xFF800000> : vector<8xf32>
    %106 = vector.multi_reduction <maximumf>, %101, %cst_79 [1] : vector<8x128xf32> to vector<8xf32>
    %107 = vector.shape_cast %106 : vector<8xf32> to vector<8x1xf32>
    %108 = arith.maximumf %103, %107 : vector<8x1xf32>
    %109 = arith.subf %103, %108 : vector<8x1xf32>
    %110 = math.exp %109 : vector<8x1xf32>
    %111 = vector.broadcast %108 : vector<8x1xf32> to vector<8x128xf32>
    %112 = arith.subf %101, %111 : vector<8x128xf32>
    %113 = math.exp %112 : vector<8x128xf32>
    %114 = arith.mulf %110, %105 : vector<8x1xf32>
    %cst_80 = arith.constant dense<0.000000e+00> : vector<8xf32>
    %115 = vector.multi_reduction <add>, %113, %cst_80 [1] : vector<8x128xf32> to vector<8xf32>
    %116 = vector.shape_cast %115 : vector<8xf32> to vector<8x1xf32>
    %117 = arith.addf %114, %116 : vector<8x1xf32>
    %c2_81 = arith.constant 2 : index
    %c0_82 = arith.constant 0 : index
    %c0_83 = arith.constant 0 : index
    %118 = vector.load %arg16[%c2_81, %c0_82, %c0_83] : memref<4x8x1xf32, #tpu.memory_space<vmem>>, vector<1x8x1xf32>
    %119 = vector.shape_cast %118 : vector<1x8x1xf32> to vector<8x1xf32>
    %120 = vector.shape_cast %117 : vector<8x1xf32> to vector<1x8x1xf32>
    tpu.vector_store %arg16[%c2_81, %c0_82, %c0_83], %120 {strides = array<i32>} : memref<4x8x1xf32, #tpu.memory_space<vmem>>, vector<1x8x1xf32>,
    %c2_84 = arith.constant 2 : index
    %c0_85 = arith.constant 0 : index
    %c0_86 = arith.constant 0 : index
    %121 = vector.load %arg15[%c2_84, %c0_85, %c0_86] : memref<4x8x1xf32, #tpu.memory_space<vmem>>, vector<1x8x1xf32>
    %122 = vector.shape_cast %121 : vector<1x8x1xf32> to vector<8x1xf32>
    %123 = vector.shape_cast %108 : vector<8x1xf32> to vector<1x8x1xf32>
    tpu.vector_store %arg15[%c2_84, %c0_85, %c0_86], %123 {strides = array<i32>} : memref<4x8x1xf32, #tpu.memory_space<vmem>>, vector<1x8x1xf32>,
    %cst_87 = arith.constant dense<0.000000e+00> : vector<8x128xf32>
    %124 = tpu.matmul %113, %14, %cst_87 {dimension_numbers = #tpu.dot_dimension_numbers<[1], [0], [0], [1], [0, 0, 1, 1], [], []>} : vector<8x128xf32>, vector<128x128xf32>, vector<8x128xf32> -> vector<8x128xf32>
    %c0_88 = arith.constant 0 : index
    %c0_89 = arith.constant 0 : index
    %125 = vector.load %arg17[%c0_88, %c0_89] : memref<8x128xf32, #tpu.memory_space<vmem>>, vector<8x128xf32>
    %cst_90 = arith.constant 1.000000e+00 : f32
    %126 = vector.broadcast %cst_90 : f32 to vector<8x1xf32>
    %127 = arith.subf %110, %126 : vector<8x1xf32>
    %128 = vector.broadcast %127 : vector<8x1xf32> to vector<8x128xf32>
    %129 = vector.broadcast %100 : vector<1x128xf32> to vector<8x128xf32>
    %130 = arith.mulf %128, %129 : vector<8x128xf32>
    %cst_91 = arith.constant 1.000000e+00 : f32
    %131 = vector.broadcast %cst_91 : f32 to vector<8x128xf32>
    %132 = arith.addf %130, %131 : vector<8x128xf32>
    %133 = arith.mulf %125, %132 : vector<8x128xf32>
    %134 = vector.broadcast %100 : vector<1x128xf32> to vector<8x128xf32>
    %135 = arith.mulf %124, %134 : vector<8x128xf32>
    %136 = arith.addf %133, %135 : vector<8x128xf32>
    %c0_92 = arith.constant 0 : index
    %c0_93 = arith.constant 0 : index
    %137 = vector.load %arg17[%c0_92, %c0_93] : memref<8x128xf32, #tpu.memory_space<vmem>>, vector<8x128xf32>
    tpu.vector_store %arg17[%c0_92, %c0_93], %136 {strides = array<i32>} : memref<8x128xf32, #tpu.memory_space<vmem>>, vector<8x128xf32>,
    %c3 = arith.constant 3 : index
    %c0_94 = arith.constant 0 : index
    %c0_95 = arith.constant 0 : index
    %138 = vector.load %arg3[%c3, %c0_94, %c0_95] : memref<4x8x128xf32, #tpu.memory_space<vmem>>, vector<1x8x128xf32>
    %139 = vector.shape_cast %138 : vector<1x8x128xf32> to vector<8x128xf32>
    %c3_96 = arith.constant 3 : index
    %c0_97 = arith.constant 0 : index
    %c0_98 = arith.constant 0 : index
    %140 = vector.load %arg8[%c3_96, %c0_97, %c0_98] : memref<4x1x128xf32, #tpu.memory_space<vmem>>, vector<1x1x128xf32>
    %141 = vector.shape_cast %140 : vector<1x1x128xf32> to vector<1x128xf32>
    %cst_99 = arith.constant dense<0.000000e+00> : vector<8x128xf32>
    %142 = tpu.matmul %139, %9, %cst_99 {dimension_numbers = #tpu.dot_dimension_numbers<[1], [1], [0], [0], [0, 0, 1, 0], [], []>} : vector<8x128xf32>, vector<128x128xf32>, vector<8x128xf32> -> vector<8x128xf32>
    %c3_100 = arith.constant 3 : index
    %c0_101 = arith.constant 0 : index
    %c0_102 = arith.constant 0 : index
    %143 = vector.load %arg15[%c3_100, %c0_101, %c0_102] : memref<4x8x1xf32, #tpu.memory_space<vmem>>, vector<1x8x1xf32>
    %144 = vector.shape_cast %143 : vector<1x8x1xf32> to vector<8x1xf32>
    %c3_103 = arith.constant 3 : index
    %c0_104 = arith.constant 0 : index
    %c0_105 = arith.constant 0 : index
    %145 = vector.load %arg16[%c3_103, %c0_104, %c0_105] : memref<4x8x1xf32, #tpu.memory_space<vmem>>, vector<1x8x1xf32>
    %146 = vector.shape_cast %145 : vector<1x8x1xf32> to vector<8x1xf32>
    %cst_106 = arith.constant dense<0xFF800000> : vector<8xf32>
    %147 = vector.multi_reduction <maximumf>, %142, %cst_106 [1] : vector<8x128xf32> to vector<8xf32>
    %148 = vector.shape_cast %147 : vector<8xf32> to vector<8x1xf32>
    %149 = arith.maximumf %144, %148 : vector<8x1xf32>
    %150 = arith.subf %144, %149 : vector<8x1xf32>
    %151 = math.exp %150 : vector<8x1xf32>
    %152 = vector.broadcast %149 : vector<8x1xf32> to vector<8x128xf32>
    %153 = arith.subf %142, %152 : vector<8x128xf32>
    %154 = math.exp %153 : vector<8x128xf32>
    %155 = arith.mulf %151, %146 : vector<8x1xf32>
    %cst_107 = arith.constant dense<0.000000e+00> : vector<8xf32>
    %156 = vector.multi_reduction <add>, %154, %cst_107 [1] : vector<8x128xf32> to vector<8xf32>
    %157 = vector.shape_cast %156 : vector<8xf32> to vector<8x1xf32>
    %158 = arith.addf %155, %157 : vector<8x1xf32>
    %c3_108 = arith.constant 3 : index
    %c0_109 = arith.constant 0 : index
    %c0_110 = arith.constant 0 : index
    %159 = vector.load %arg16[%c3_108, %c0_109, %c0_110] : memref<4x8x1xf32, #tpu.memory_space<vmem>>, vector<1x8x1xf32>
    %160 = vector.shape_cast %159 : vector<1x8x1xf32> to vector<8x1xf32>
    %161 = vector.shape_cast %158 : vector<8x1xf32> to vector<1x8x1xf32>
    tpu.vector_store %arg16[%c3_108, %c0_109, %c0_110], %161 {strides = array<i32>} : memref<4x8x1xf32, #tpu.memory_space<vmem>>, vector<1x8x1xf32>,
    %c3_111 = arith.constant 3 : index
    %c0_112 = arith.constant 0 : index
    %c0_113 = arith.constant 0 : index
    %162 = vector.load %arg15[%c3_111, %c0_112, %c0_113] : memref<4x8x1xf32, #tpu.memory_space<vmem>>, vector<1x8x1xf32>
    %163 = vector.shape_cast %162 : vector<1x8x1xf32> to vector<8x1xf32>
    %164 = vector.shape_cast %149 : vector<8x1xf32> to vector<1x8x1xf32>
    tpu.vector_store %arg15[%c3_111, %c0_112, %c0_113], %164 {strides = array<i32>} : memref<4x8x1xf32, #tpu.memory_space<vmem>>, vector<1x8x1xf32>,
    %cst_114 = arith.constant dense<0.000000e+00> : vector<8x128xf32>
    %165 = tpu.matmul %154, %14, %cst_114 {dimension_numbers = #tpu.dot_dimension_numbers<[1], [0], [0], [1], [0, 0, 1, 1], [], []>} : vector<8x128xf32>, vector<128x128xf32>, vector<8x128xf32> -> vector<8x128xf32>
    %c0_115 = arith.constant 0 : index
    %c0_116 = arith.constant 0 : index
    %166 = vector.load %arg17[%c0_115, %c0_116] : memref<8x128xf32, #tpu.memory_space<vmem>>, vector<8x128xf32>
    %cst_117 = arith.constant 1.000000e+00 : f32
    %167 = vector.broadcast %cst_117 : f32 to vector<8x1xf32>
    %168 = arith.subf %151, %167 : vector<8x1xf32>
    %169 = vector.broadcast %168 : vector<8x1xf32> to vector<8x128xf32>
    %170 = vector.broadcast %141 : vector<1x128xf32> to vector<8x128xf32>
    %171 = arith.mulf %169, %170 : vector<8x128xf32>
    %cst_118 = arith.constant 1.000000e+00 : f32
    %172 = vector.broadcast %cst_118 : f32 to vector<8x128xf32>
    %173 = arith.addf %171, %172 : vector<8x128xf32>
    %174 = arith.mulf %166, %173 : vector<8x128xf32>
    %175 = vector.broadcast %141 : vector<1x128xf32> to vector<8x128xf32>
    %176 = arith.mulf %165, %175 : vector<8x128xf32>
    %177 = arith.addf %174, %176 : vector<8x128xf32>
    %c0_119 = arith.constant 0 : index
    %c0_120 = arith.constant 0 : index
    %178 = vector.load %arg17[%c0_119, %c0_120] : memref<8x128xf32, #tpu.memory_space<vmem>>, vector<8x128xf32>
    tpu.vector_store %arg17[%c0_119, %c0_120], %177 {strides = array<i32>} : memref<8x128xf32, #tpu.memory_space<vmem>>, vector<8x128xf32>,
    %c1_i32 = arith.constant 1 : i32
    %179 = arith.cmpi eq, %arg1, %c1_i32 : i32
    %180 = arith.extui %179 : i1 to i32
    %c0_i32_121 = arith.constant 0 : i32
    %181 = arith.cmpi ne, %180, %c0_i32_121 : i32
    scf.if %181 {
      %cst_122 = arith.constant 0.000000e+00 : f32
      %182 = vector.broadcast %cst_122 : f32 to vector<8x128xf32>
      %c0_123 = arith.constant 0 : index
      %c0_124 = arith.constant 0 : index
      %c0_125 = arith.constant 0 : index
      %183 = vector.load %arg16[%c0_123, %c0_124, %c0_125] : memref<4x8x1xf32, #tpu.memory_space<vmem>>, vector<1x8x1xf32>
      %184 = vector.shape_cast %183 : vector<1x8x1xf32> to vector<8x1xf32>
      %c0_126 = arith.constant 0 : index
      %c0_127 = arith.constant 0 : index
      %c0_128 = arith.constant 0 : index
      %185 = vector.load %arg8[%c0_126, %c0_127, %c0_128] : memref<4x1x128xf32, #tpu.memory_space<vmem>>, vector<1x1x128xf32>
      %186 = vector.shape_cast %185 : vector<1x1x128xf32> to vector<1x128xf32>
      %187 = vector.broadcast %184 : vector<8x1xf32> to vector<8x128xf32>
      %188 = vector.broadcast %186 : vector<1x128xf32> to vector<8x128xf32>
      %189 = arith.mulf %187, %188 : vector<8x128xf32>
      %190 = arith.addf %182, %189 : vector<8x128xf32>
      %c1_129 = arith.constant 1 : index
      %c0_130 = arith.constant 0 : index
      %c0_131 = arith.constant 0 : index
      %191 = vector.load %arg16[%c1_129, %c0_130, %c0_131] : memref<4x8x1xf32, #tpu.memory_space<vmem>>, vector<1x8x1xf32>
      %192 = vector.shape_cast %191 : vector<1x8x1xf32> to vector<8x1xf32>
      %c1_132 = arith.constant 1 : index
      %c0_133 = arith.constant 0 : index
      %c0_134 = arith.constant 0 : index
      %193 = vector.load %arg8[%c1_132, %c0_133, %c0_134] : memref<4x1x128xf32, #tpu.memory_space<vmem>>, vector<1x1x128xf32>
      %194 = vector.shape_cast %193 : vector<1x1x128xf32> to vector<1x128xf32>
      %195 = vector.broadcast %192 : vector<8x1xf32> to vector<8x128xf32>
      %196 = vector.broadcast %194 : vector<1x128xf32> to vector<8x128xf32>
      %197 = arith.mulf %195, %196 : vector<8x128xf32>
      %198 = arith.addf %190, %197 : vector<8x128xf32>
      %c2_135 = arith.constant 2 : index
      %c0_136 = arith.constant 0 : index
      %c0_137 = arith.constant 0 : index
      %199 = vector.load %arg16[%c2_135, %c0_136, %c0_137] : memref<4x8x1xf32, #tpu.memory_space<vmem>>, vector<1x8x1xf32>
      %200 = vector.shape_cast %199 : vector<1x8x1xf32> to vector<8x1xf32>
      %c2_138 = arith.constant 2 : index
      %c0_139 = arith.constant 0 : index
      %c0_140 = arith.constant 0 : index
      %201 = vector.load %arg8[%c2_138, %c0_139, %c0_140] : memref<4x1x128xf32, #tpu.memory_space<vmem>>, vector<1x1x128xf32>
      %202 = vector.shape_cast %201 : vector<1x1x128xf32> to vector<1x128xf32>
      %203 = vector.broadcast %200 : vector<8x1xf32> to vector<8x128xf32>
      %204 = vector.broadcast %202 : vector<1x128xf32> to vector<8x128xf32>
      %205 = arith.mulf %203, %204 : vector<8x128xf32>
      %206 = arith.addf %198, %205 : vector<8x128xf32>
      %c3_141 = arith.constant 3 : index
      %c0_142 = arith.constant 0 : index
      %c0_143 = arith.constant 0 : index
      %207 = vector.load %arg16[%c3_141, %c0_142, %c0_143] : memref<4x8x1xf32, #tpu.memory_space<vmem>>, vector<1x8x1xf32>
      %208 = vector.shape_cast %207 : vector<1x8x1xf32> to vector<8x1xf32>
      %c3_144 = arith.constant 3 : index
      %c0_145 = arith.constant 0 : index
      %c0_146 = arith.constant 0 : index
      %209 = vector.load %arg8[%c3_144, %c0_145, %c0_146] : memref<4x1x128xf32, #tpu.memory_space<vmem>>, vector<1x1x128xf32>
      %210 = vector.shape_cast %209 : vector<1x1x128xf32> to vector<1x128xf32>
      %211 = vector.broadcast %208 : vector<8x1xf32> to vector<8x128xf32>
      %212 = vector.broadcast %210 : vector<1x128xf32> to vector<8x128xf32>
      %213 = arith.mulf %211, %212 : vector<8x128xf32>
      %214 = arith.addf %206, %213 : vector<8x128xf32>
      %c0_147 = arith.constant 0 : index
      %c0_148 = arith.constant 0 : index
      %215 = vector.load %arg17[%c0_147, %c0_148] : memref<8x128xf32, #tpu.memory_space<vmem>>, vector<8x128xf32>
      %216 = arith.divf %215, %214 : vector<8x128xf32>
      %c0_149 = arith.constant 0 : index
      %c0_150 = arith.constant 0 : index
      %217 = vector.load %arg9[%c0_149, %c0_150] : memref<128x128xf32, #tpu.memory_space<vmem>>, vector<128x128xf32>
      %cst_151 = arith.constant dense<0.000000e+00> : vector<8x128xf32>
      %218 = tpu.matmul %216, %217, %cst_151 {dimension_numbers = #tpu.dot_dimension_numbers<[1], [0], [0], [1], [0, 0, 1, 1], [], []>} : vector<8x128xf32>, vector<128x128xf32>, vector<8x128xf32> -> vector<8x128xf32>
      %c0_152 = arith.constant 0 : index
      %c0_153 = arith.constant 0 : index
      %219 = vector.load %arg10[%c0_152, %c0_153] : memref<1x128xf32, #tpu.memory_space<vmem>>, vector<1x128xf32>
      %220 = vector.broadcast %219 : vector<1x128xf32> to vector<8x128xf32>
      %221 = arith.addf %218, %220 : vector<8x128xf32>
      %c0_154 = arith.constant 0 : index
      %c0_155 = arith.constant 0 : index
      %222 = vector.load %arg11[%c0_154, %c0_155] : memref<8x128xf32, #tpu.memory_space<vmem>>, vector<8x128xf32>
      %223 = arith.addf %222, %221 : vector<8x128xf32>
      %c0_156 = arith.constant 0 : index
      %c0_157 = arith.constant 0 : index
      %224 = vector.load %arg12[%c0_156, %c0_157] : memref<128x128xf32, #tpu.memory_space<vmem>>, vector<128x128xf32>
      %cst_158 = arith.constant dense<0.000000e+00> : vector<8x128xf32>
      %225 = tpu.matmul %223, %224, %cst_158 {dimension_numbers = #tpu.dot_dimension_numbers<[1], [0], [0], [1], [0, 0, 1, 1], [], []>} : vector<8x128xf32>, vector<128x128xf32>, vector<8x128xf32> -> vector<8x128xf32>
      %c0_159 = arith.constant 0 : index
      %c0_160 = arith.constant 0 : index
      %226 = vector.load %arg13[%c0_159, %c0_160] : memref<1x128xf32, #tpu.memory_space<vmem>>, vector<1x128xf32>
      %227 = vector.broadcast %226 : vector<1x128xf32> to vector<8x128xf32>
      %228 = arith.addf %225, %227 : vector<8x128xf32>
      %cst_161 = arith.constant 0.000000e+00 : f32
      %229 = vector.broadcast %cst_161 : f32 to vector<8x128xf32>
      %230 = arith.maximumf %228, %229 : vector<8x128xf32>
      %231 = arith.addf %223, %230 : vector<8x128xf32>
      %c0_162 = arith.constant 0 : index
      %c0_163 = arith.constant 0 : index
      %c0_164 = arith.constant 0 : index
      %232 = vector.load %arg14[%c0_162, %c0_163, %c0_164] : memref<1x8x128xf32, #tpu.memory_space<vmem>>, vector<1x8x128xf32>
      %233 = vector.shape_cast %232 : vector<1x8x128xf32> to vector<8x128xf32>
      %234 = vector.shape_cast %231 : vector<8x128xf32> to vector<1x8x128xf32>
      tpu.vector_store %arg14[%c0_162, %c0_163, %c0_164], %234 {strides = array<i32>} : memref<1x8x128xf32, #tpu.memory_space<vmem>>, vector<1x8x128xf32>,
    } else {
    }
    return
  }
  func.func @transform_0(%arg0: i32, %arg1: i32) -> (i32, i32, i32) {
    %c0_i32 = arith.constant 0 : i32
    %c0_i32_0 = arith.constant 0 : i32
    return %arg0, %arg1, %c0_i32 : i32, i32, i32
  }
  func.func @transform_1(%arg0: i32, %arg1: i32) -> (i32, i32, i32) {
    %c0_i32 = arith.constant 0 : i32
    %c0_i32_0 = arith.constant 0 : i32
    %c0_i32_1 = arith.constant 0 : i32
    %c0_i32_2 = arith.constant 0 : i32
    return %c0_i32, %c0_i32_0, %c0_i32_1 : i32, i32, i32
  }
  func.func @transform_2(%arg0: i32, %arg1: i32) -> (i32, i32) {
    %c0_i32 = arith.constant 0 : i32
    %c0_i32_0 = arith.constant 0 : i32
    %c0_i32_1 = arith.constant 0 : i32
    return %c0_i32, %c0_i32_0 : i32, i32
  }
  func.func @transform_3(%arg0: i32, %arg1: i32) -> (i32, i32) {
    %c0_i32 = arith.constant 0 : i32
    %c0_i32_0 = arith.constant 0 : i32
    %c0_i32_1 = arith.constant 0 : i32
    return %c0_i32, %c0_i32_0 : i32, i32
  }
  func.func @transform_4(%arg0: i32, %arg1: i32) -> (i32, i32) {
    %c0_i32 = arith.constant 0 : i32
    %c0_i32_0 = arith.constant 0 : i32
    %c0_i32_1 = arith.constant 0 : i32
    return %c0_i32, %c0_i32_0 : i32, i32
  }
  func.func @transform_5(%arg0: i32, %arg1: i32) -> (i32, i32) {
    %c0_i32 = arith.constant 0 : i32
    %c0_i32_0 = arith.constant 0 : i32
    %c0_i32_1 = arith.constant 0 : i32
    return %c0_i32, %c0_i32_0 : i32, i32
  }
  func.func @transform_6(%arg0: i32, %arg1: i32) -> (i32, i32, i32) {
    %c0_i32 = arith.constant 0 : i32
    %c0_i32_0 = arith.constant 0 : i32
    %c0_i32_1 = arith.constant 0 : i32
    %c0_i32_2 = arith.constant 0 : i32
    return %c0_i32, %c0_i32_0, %c0_i32_1 : i32, i32, i32
  }
  func.func @transform_7(%arg0: i32, %arg1: i32) -> (i32, i32) {
    %c0_i32 = arith.constant 0 : i32
    %c0_i32_0 = arith.constant 0 : i32
    %c0_i32_1 = arith.constant 0 : i32
    return %c0_i32, %c0_i32_0 : i32, i32
  }
  func.func @transform_8(%arg0: i32, %arg1: i32) -> (i32, i32) {
    %c0_i32 = arith.constant 0 : i32
    %c0_i32_0 = arith.constant 0 : i32
    %c0_i32_1 = arith.constant 0 : i32
    return %c0_i32, %c0_i32_0 : i32, i32
  }
  func.func @transform_9(%arg0: i32, %arg1: i32) -> (i32, i32) {
    %c0_i32 = arith.constant 0 : i32
    %c0_i32_0 = arith.constant 0 : i32
    %c0_i32_1 = arith.constant 0 : i32
    return %c0_i32, %c0_i32_0 : i32, i32
  }
  func.func @transform_10(%arg0: i32, %arg1: i32) -> (i32, i32) {
    %c0_i32 = arith.constant 0 : i32
    %c0_i32_0 = arith.constant 0 : i32
    %c0_i32_1 = arith.constant 0 : i32
    return %c0_i32, %c0_i32_0 : i32, i32
  }
  func.func @transform_11(%arg0: i32, %arg1: i32) -> (i32, i32) {
    %c0_i32 = arith.constant 0 : i32
    %c0_i32_0 = arith.constant 0 : i32
    %c0_i32_1 = arith.constant 0 : i32
    return %c0_i32, %c0_i32_0 : i32, i32
  }
  func.func @transform_12(%arg0: i32, %arg1: i32) -> (i32, i32, i32) {
    %c0_i32 = arith.constant 0 : i32
    %c0_i32_0 = arith.constant 0 : i32
    %c0_i32_1 = arith.constant 0 : i32
    return %arg0, %c0_i32, %c0_i32_0 : i32, i32, i32
  }
}

</mosaic_0001>

<bundles_post_ra>
// kernel: tpu_custom_call.1
= control target key start
LH: loop header
LB: loop body
LE: loop exit
PB: predicated region body
PF: predicated region fallthrough
CT: control target
= control target key end

     0   :  { %s4459_s0 = inlined_call_operand.hbm [shape: f32[2,256,128], index: 0, kind: input, shape index: {}]   ;;  %s4460_s1 = inlined_call_operand.hbm [shape: f32[4,8,128], index: 1, kind: input, shape index: {}]   ;;  %s4461_s2 = inlined_call_operand.hbm [shape: f32[128,128], index: 2, kind: input, shape index: {}]   ;;  %s4462_s3 = inlined_call_operand.vmem [shape: f32[1,128], index: 3, kind: input, shape index: {}]   ;;  %s4463_s4 = inlined_call_operand.hbm [shape: f32[128,128], index: 4, kind: input, shape index: {}]   ;;  %s4464_s5 = inlined_call_operand.vmem [shape: f32[1,128], index: 5, kind: input, shape index: {}]   ;;  %s4465_s6 = inlined_call_operand.vmem [shape: f32[4,1,128], index: 6, kind: input, shape index: {}]   ;;  %s4466_s7 = inlined_call_operand.hbm [shape: f32[128,128], index: 7, kind: input, shape index: {}]   ;;  %s4467_s8 = inlined_call_operand.vmem [shape: f32[1,128], index: 8, kind: input, shape index: {}]   ;;  %s4468_s9 = inlined_call_operand.vmem [shape: f32[8,128], index: 9, kind: input, shape index: {}]   ;;  %s4469_s10 = inlined_call_operand.hbm [shape: f32[128,128], index: 10, kind: input, shape index: {}]   ;;  %s4470_s11 = inlined_call_operand.vmem [shape: f32[1,128], index: 11, kind: input, shape index: {}]   ;;  %s4471_s12 = inlined_call_operand.hbm [shape: f32[2,8,128], index: 12, kind: output, shape index: {}]  }
   0x1   :  { %4484 = sst [smem:[#allocation25_spill]] %s4459_s0 }
   0x2   :  { %4485 = sst [smem:[#allocation26_spill]] %s4460_s1 }
   0x3   :  { %4486 = sst [smem:[#allocation27_spill]] %s4461_s2 }
   0x4   :  { %4487 = sst [smem:[#allocation28_spill]] %s4462_s3 }
   0x5   :  { %4488 = sst [smem:[#allocation29_spill]] %s4463_s4 }
   0x6   :  { %4489 = sst [smem:[#allocation30_spill]] %s4464_s5 }
   0x7   :  { %4490 = sst [smem:[#allocation31_spill]] %s4465_s6 }
   0x8   :  { %4491 = sst [smem:[#allocation32_spill]] %s4466_s7 }
   0x9   :  { %4492 = sst [smem:[#allocation33_spill]] %s4467_s8 }
   0xa   :  { %4493 = sst [smem:[#allocation34_spill]] %s4468_s9 }
   0xb   :  { %4494 = sst [smem:[#allocation35_spill]] %s4470_s11 }
   0xc   :  { %4495 = sst [smem:[#allocation36_spill]] %s4471_s12 }
   0xd   :  { %17 = vsyncpa [#allocation6], 0 }
   0xe   :  { %19 = vsyncpa [#allocation6 + $0x1], 0 }
   0xf   :  { %20 = vsyncpa [#allocation9], 0 }
  0x10   :  { %21 = vsyncpa [#allocation12], 0 }
  0x11   :  { %22 = vsyncpa [#allocation15], 0 }
  0x12   :  { %23 = vsyncpa [#allocation7], 0 }
  0x13   :  { %25 = vsyncpa [#allocation7 + $0x1], 0  ;;  %s3663_s21 = smov 0   ;;  %s3665_s22 = smov 0  }
  0x14   :  { %s3667_s23 = smov 0   ;;  %s3669_s24 = smov 0  }
  0x15   :  { %s3671_s25 = smov 0   ;;  %s3673_s26 = smov 0  }
  0x16   :  { %s3675_s27 = smov 0   ;;  %s3677_s28 = smov 0  }
  0x17   :  { %s3679_s29 = smov 0   ;;  %s3681_s30 = smov 0  }
  0x18   :  { %s3683_s13 = smov 0  }
  0x19 LB: > { %4496 = sst [smem:[#allocation22_spill]] %s3561_s27  ;;  %s4472_s14 = sadd.s32 4294967295, %s3577_s13   ;;  %s3577_s13 = sphi %s3683_s13, %s31_s13   ;;  %s3573_s30 = sphi %s3681_s30, %s4543_s30   ;;  %s3569_s29 = sphi %s3679_s29, %s4542_s29   ;;  %s3565_s28 = sphi %s3677_s28, %s4541_s28   ;;  %s3561_s27 = sphi %s3675_s27, %s4540_s27   ;;  %s3557_s26 = sphi %s3673_s26, %s4539_s26   ;;  %s3553_s25 = sphi %s3671_s25, %s4538_s25   ;;  %s3549_s24 = sphi %s3669_s24, %s4537_s24   ;;  %s3545_s23 = sphi %s3667_s23, %s4536_s23   ;;  %s3541_s22 = sphi %s3665_s22, %s4535_s22   ;;  %s3537_s21 = sphi %s3663_s21, %s4534_s21  }
  0x1a   : > { %4497 = sst [smem:[#allocation23_spill]] %s3565_s28  ;;  %p2039_p0 = scmp.ge.s32.totalorder %s3577_s13, 1 }
  0x1b   : > { %p3722_p1 = scmp.eq.s32.totalorder %s4472_s14, 0  ;;  %p333_p2 = scmp.lt.s32.totalorder %s3577_s13, 5 }
  0x1c   : > { %s3579_s17 = smov [#allocation8]   ;;  %s3580_s20 = smov [#allocation11]  }
  0x1d   : > { %s4498_s15 = scalar_select %p3722_p1, 1, 0 }
  0x1e   : > { %p3727_p3 = pnand %p2039_p0, %p333_p2  ;;  %s345_s18 = sshll.u32 %s3579_s17, 4  ;;  %s3731_s18 = int_to_ptr.vmem [resolvable:$true] %s345_s18 }
  0x1f   : > { %s374_s14 = sshll.u32 %s3580_s20, 4  ;;  %s3581_s12 = smov [#allocation10]   ;;  %s3741_s14 = int_to_ptr.vmem [resolvable:$true] %s374_s14 }
  0x20   : > { %s4499_s16 = scalar_select %p3727_p3, 1, 0 }
  0x21   : > { %p3110_p4 = pneg %p3727_p3  ;;  %s358_s28 = sshll.u32 %s3581_s12, 4  ;;  %s3743_s28 = int_to_ptr.vmem [resolvable:$true] %s358_s28 }
  0x22   : > { %4500 = sst [smem:[#allocation24_spill]] %s4499_s16  ;;  %s4502_s1 = sld [smem:[#allocation26_spill]] }
  0x23   : > { %p3737_p5 = pnand %p3110_p4, %p3722_p1 }
  0x25   : > { %p3753_p7 = pneg %p3737_p5 }
  0x28   : > { %s3273_s9 = scalar_lea.hbm %s4502_s1, 512 }
  0x29   : > { %p3274_p6 = scmp.ne.s32.totalorder %s4502_s1, %s3273_s9  ;;  %p3280_p10 = scmp.lt.u32.totalorder %s3273_s9, %s4502_s1 }
  0x2b   : > { %p3276_p8 = pnand %p3753_p7, %p3274_p6 }
  0x2d   : > { %p3277_p9 = pneg %p3276_p8 }
  0x2f   : > { %p3282_p11 = pnand %p3280_p10, %p3277_p9 }
  0x31   : > { %3285 = shalt.err (!%p3282_p11)
}
  0x32   : > { %s3286_s6 = scalar_lea.vmem %s3731_s18, 512  ;;  %p3294_p2 = scmp.lt.s32.totalorder %s3731_s18, %s3731_s18 }
  0x33   : > { %p3287_p12 = scmp.ne.s32.totalorder %s3731_s18, %s3286_s6  ;;  %p3295_p4 = scmp.lt.s32.totalorder %s3286_s6, %s3286_s6 }
  0x35   : > { %p3289_p13 = pnand %p3287_p12, %p3753_p7  ;;  %p3296_p6 = por %p3295_p4, %p3294_p2 }
  0x37   : > { %p3290_p0 = pneg %p3289_p13 }
  0x39   : > { %p3297_p8 = pnand %p3296_p6, %p3290_p0 }
  0x3b   : > { %3300 = shalt.err (!%p3297_p8)
}
  0x3c   : > { %s4481_s8 = smov 128   ;;  %s4482_s9 = smov 8  }
  0x3d   : > { %3113 = dma.hbm_to_vmem [thread:$0]  (!%p3737_p5), %s4502_s1, 512, %s3731_s18, [#allocation9], %s4481_s8, %s4481_s8, %s4482_s9  }
  0x3e   : > { %s4504_s4 = sld [smem:[#allocation29_spill]] }
  0x44   : > { %s3301_s6 = scalar_lea.hbm %s4504_s4, 2048 }
  0x45   : > { %p3302_p9 = scmp.ne.s32.totalorder %s4504_s4, %s3301_s6  ;;  %p3308_p12 = scmp.lt.u32.totalorder %s3301_s6, %s4504_s4 }
  0x47   : > { %p3304_p10 = pnand %p3302_p9, %p3753_p7 }
  0x49   : > { %p3305_p11 = pneg %p3304_p10 }
  0x4b   : > { %p3310_p13 = pnand %p3308_p12, %p3305_p11 }
  0x4d   : > { %3313 = shalt.err (!%p3310_p13)
}
  0x4e   : > { %s3314_s18 = scalar_lea.vmem %s3741_s14, 2048  ;;  %p3322_p6 = scmp.lt.s32.totalorder %s3741_s14, %s3741_s14 }
  0x4f   : > { %p3315_p0 = scmp.ne.s32.totalorder %s3741_s14, %s3314_s18  ;;  %p3323_p8 = scmp.lt.s32.totalorder %s3314_s18, %s3314_s18 }
  0x51   : > { %p3317_p2 = pnand %p3315_p0, %p3753_p7  ;;  %p3324_p9 = por %p3323_p8, %p3322_p6 }
  0x53   : > { %p3318_p4 = pneg %p3317_p2 }
  0x55   : > { %p3325_p10 = pnand %p3324_p9, %p3318_p4 }
  0x57   : > { %3328 = shalt.err (!%p3325_p10)
}
  0x58   : > { %3119 = dma.hbm_to_vmem [thread:$0]  (!%p3737_p5), %s4504_s4, 2048, %s3741_s14, [#allocation12], %s4481_s8, %s4481_s8, %s4482_s9  }
  0x59   : > { %s4505_s2 = sld [smem:[#allocation27_spill]] }
  0x5f   : > { %s3329_s11 = scalar_lea.hbm %s4505_s2, 2048 }
  0x60   : > { %p3330_p11 = scmp.ne.s32.totalorder %s4505_s2, %s3329_s11  ;;  %p3336_p0 = scmp.lt.u32.totalorder %s3329_s11, %s4505_s2 }
  0x62   : > { %p3332_p12 = pnand %p3330_p11, %p3753_p7 }
  0x64   : > { %p3333_p13 = pneg %p3332_p12 }
  0x66   : > { %p3338_p2 = pnand %p3336_p0, %p3333_p13 }
  0x68   : > { %3341 = shalt.err (!%p3338_p2)
}
  0x69   : > { %s3342_s14 = scalar_lea.vmem %s3743_s28, 2048  ;;  %p3350_p9 = scmp.lt.s32.totalorder %s3743_s28, %s3743_s28 }
  0x6a   : > { %p3343_p4 = scmp.ne.s32.totalorder %s3743_s28, %s3342_s14  ;;  %p3351_p10 = scmp.lt.s32.totalorder %s3342_s14, %s3342_s14 }
  0x6c   : > { %p3345_p6 = pnand %p3343_p4, %p3753_p7  ;;  %p3352_p11 = por %p3351_p10, %p3350_p9 }
  0x6e   : > { %p3346_p8 = pneg %p3345_p6 }
  0x70   : > { %p3353_p12 = pnand %p3352_p11, %p3346_p8 }
  0x72   : > { %3356 = shalt.err (!%p3353_p12)
}
  0x73   : > { %3116 = dma.hbm_to_vmem [thread:$0]  (!%p3737_p5), %s4505_s2, 2048, %s3743_s28, [#allocation9], %s4481_s8, %s4481_s8, %s4482_s9  }
  0x74   : > { %s3584_s3 = smov [#allocation13]   ;;  %s3585_s16 = smov [#allocation14]  }
  0x75   : > { %s393_s27 = sshll.u32 %s3584_s3, 4  ;;  %s412_s11 = sshll.u32 %s3585_s16, 4  ;;  %s394_s27 = int_to_ptr.vmem [resolvable:$true] %s393_s27  ;;  %s3829_s11 = int_to_ptr.vmem [resolvable:$true] %s412_s11 }
  0x76   : > { %s4506_s7 = sld [smem:[#allocation32_spill]] }
  0x7c   : > { %s3357_s20 = scalar_lea.hbm %s4506_s7, 2048 }
  0x7d   : > { %p3358_p13 = scmp.ne.s32.totalorder %s4506_s7, %s3357_s20  ;;  %p3364_p4 = scmp.lt.u32.totalorder %s3357_s20, %s4506_s7 }
  0x7f   : > { %p3360_p0 = pnand %p3358_p13, %p3753_p7 }
  0x81   : > { %p3361_p2 = pneg %p3360_p0 }
  0x83   : > { %p3366_p6 = pnand %p3364_p4, %p3361_p2 }
  0x85   : > { %3369 = shalt.err (!%p3366_p6)
}
  0x86   : > { %s3370_s0 = scalar_lea.vmem %s394_s27, 2048  ;;  %p3378_p11 = scmp.lt.s32.totalorder %s394_s27, %s394_s27 }
  0x87   : > { %p3371_p8 = scmp.ne.s32.totalorder %s394_s27, %s3370_s0  ;;  %p3379_p12 = scmp.lt.s32.totalorder %s3370_s0, %s3370_s0 }
  0x89   : > { %p3373_p9 = pnand %p3371_p8, %p3753_p7  ;;  %p3380_p3 = por %p3379_p12, %p3378_p11 }
  0x8b   : > { %p3374_p10 = pneg %p3373_p9 }
  0x8d   : > { %p3381_p1 = pnand %p3380_p3, %p3374_p10 }
  0x8f   : > { %3384 = shalt.err (!%p3381_p1)
}
  0x90   : > { %3122 = dma.hbm_to_vmem [thread:$0]  (!%p3737_p5), %s4506_s7, 2048, %s394_s27, [#allocation12], %s4481_s8, %s4481_s8, %s4482_s9  }
  0x91   : > { %s3385_s20 = scalar_lea.hbm %s4469_s10, 2048 }
  0x92   : > { %p3386_p13 = scmp.ne.s32.totalorder %s4469_s10, %s3385_s20  ;;  %p3392_p0 = scmp.lt.u32.totalorder %s3385_s20, %s4469_s10 }
  0x94   : > { %p3388_p1 = pnand %p3386_p13, %p3753_p7 }
  0x96   : > { %p3389_p3 = pneg %p3388_p1 }
  0x98   : > { %p3394_p2 = pnand %p3392_p0, %p3389_p3 }
  0x9a   : > { %3397 = shalt.err (!%p3394_p2)
}
  0x9b   : > { %s3398_s27 = scalar_lea.vmem %s3829_s11, 2048  ;;  %p3406_p9 = scmp.lt.s32.totalorder %s3829_s11, %s3829_s11 }
  0x9c   : > { %p3399_p4 = scmp.ne.s32.totalorder %s3829_s11, %s3398_s27  ;;  %p3407_p10 = scmp.lt.s32.totalorder %s3398_s27, %s3398_s27 }
  0x9e   : > { %p3401_p6 = pnand %p3399_p4, %p3753_p7  ;;  %p3408_p11 = por %p3407_p10, %p3406_p9 }
  0xa0   : > { %p3402_p8 = pneg %p3401_p6 }
  0xa2   : > { %p3409_p12 = pnand %p3408_p11, %p3402_p8 }
  0xa4   : > { %3412 = shalt.err (!%p3409_p12)
}
  0xa5   : > { %3125 = dma.hbm_to_vmem [thread:$0]  (!%p3737_p5), %s4469_s10, 2048, %s3829_s11, [#allocation15], %s4481_s8, %s4481_s8, %s4482_s9  }
  0xa6   : > { %s4507_s5 = sadd.s32 4294967295, %s3577_s13   ;;  %s40_s16 = sadd.s32 1, %s3569_s29 }
  0xa7   : > { %p3880_p7 = scmp.eq.s32.totalorder %s4507_s5, 3  ;;  %p41_p13 = scmp.ge.s32.totalorder %s40_s16, 2 }
  0xa8   : > { %s43_s17 = sadd.s32 1, %s3573_s30  ;;  %s2038_s12 = sadd.s32 4294967294, %s3577_s13  }
  0xa9   : > { %s52_s20 = sadd.s32 1, %s3557_s26  ;;  %s4545_s16 = smov (%p41_p13, %s40_s16), 0 }
  0xaa   : > { %s4547_s17 = smov (!%p41_p13, %s43_s17), %s3573_s30  ;;  %s48_s11 = ssub.s32 %s3569_s29, %s4545_s16 }
  0xab   : > { %p59_p5 = scmp.ne.s32.totalorder %s3557_s26, %s3553_s25  ;;  %p45_p1 = scmp.ge.s32.totalorder %s4547_s17, 2 }
  0xac   : > { %p65_p3 = scmp.ne.s32.totalorder %s3553_s25, %s3549_s24  ;;  %p60_p0 = scmp.eq.s32.totalorder %s3577_s13, 0 }
  0xad   : > { %s309_s6 = sadd.s32 1, %s3545_s23  ;;  %s4549_s17 = smov (%p45_p1, %s4547_s17), 0 }
  0xae   : > { %p4509_p2 = scmp.ne.s32.totalorder %s4498_s15, 0  ;;  %p319_p6 = scmp.ne.s32.totalorder %s3545_s23, %s3541_s22 }
  0xaf   : > { %s47_s18 = ssub.s32 %s3573_s30, %s4549_s17  ;;  %p325_p8 = scmp.ne.s32.totalorder %s3541_s22, %s3537_s21 }
  0xb0   : > { %p3903_p4 = por %p4509_p2, %p65_p3  ;;  %s49_s28 = sor.u32 %s48_s11, %s47_s18 }
  0xb1   : > { %p307_p9 = scmp.eq.s32.totalorder %s47_s18, 0  ;;  %p50_p10 = scmp.eq.s32.totalorder %s49_s28, 0 }
  0xb2   : > { %p3915_p11 = por %p3880_p7, %p319_p6  ;;  %p3930_p12 = por %p60_p0, %p59_p5 }
  0xb3   : > { %s3920_s27 = scalar_select %p307_p9, %s3545_s23, %s309_s6  }
  0xb4   : > { %s4511_s24 = scalar_select %p3915_p11, 1, 0 }
  0xb5   : > { %s3923_s0 = scalar_select %p50_p10, %s3557_s26, %s52_s20  }
  0xb6   : > { %p326_p13 = scmp.eq.s32.totalorder %s2038_s12, 3  ;;  %s429_s5 = sand.u32 1, %s3557_s26  }
  0xb7   : > { %s2047_s11 = sshll.u32 %s3569_s29, 4  ;;  %p3139_p7 = scmp.lt.s32.totalorder %s3577_s13, 4 }
  0xb8   : > { %p3936_p1 = por %p326_p13, %p325_p8  ;;  %s2046_s18 = sshll.u32 %s429_s5, 7 }
  0xb9   : > { %s2048_s6 = sshll.u32 %s3573_s30, 5  ;;  %s433_s8 = scalar_lea.vmem [#allocation5], %s2046_s18 }
  0xba   : > { %s4513_s19 = scalar_select %p3936_p1, 1, 0 }
  0xbb   : > { %s439_s28 = sadd.s32 %s2048_s6, %s2047_s11  ;;  %s442_s9 = sshll.u32 %s433_s8, 4  ;;  %s3947_s9 = int_to_ptr.vmem [resolvable:$true] %s442_s9 }
  0xbc   : > { %s2049_s20 = sshll.u32 %s439_s28, 7  ;;  %s4514_s4 = sld [smem:[#allocation25_spill]] }
  0xbd   : > { %p3951_p5 = pnand %p3139_p7, %p3930_p12  ;;  %s3955_s11 = scalar_lea.sflag [#allocation6], %s429_s5 }
  0xbf   : > { %p3415_p0 = pneg %p3951_p5 }
  0xc2   : > { %s3945_s7 = scalar_lea.hbm %s4514_s4, %s2049_s20  ;;  %s3418_s3 = scalar_lea.hbm %s4514_s4, 8192 }
  0xc3   : > { %s3413_s8 = scalar_lea.hbm %s3945_s7, 2048  ;;  %p3419_p8 = scmp.lt.u32.totalorder %s3945_s7, %s4514_s4 }
  0xc4   : > { %p3414_p3 = scmp.ne.s32.totalorder %s3945_s7, %s3413_s8  ;;  %p3420_p9 = scmp.lt.u32.totalorder %s3418_s3, %s3413_s8 }
  0xc5   : > { %p3422_p12 = scmp.lt.u32.totalorder %s3413_s8, %s3945_s7 }
  0xc6   : > { %p3416_p2 = pnand %p3415_p0, %p3414_p3  ;;  %p3421_p10 = por %p3420_p9, %p3419_p8 }
  0xc8   : > { %p3417_p6 = pneg %p3416_p2  ;;  %p3423_p13 = por %p3422_p12, %p3421_p10 }
  0xca   : > { %p3424_p7 = pnand %p3423_p13, %p3417_p6 }
  0xcc   : > { %3427 = shalt.err (!%p3424_p7)
}
  0xcd   : > { %s3428_s5 = scalar_lea.vmem %s3947_s9, 2048  ;;  %s3586_s28 = smov [#allocation5]  }
  0xce   : > { %p3429_p3 = scmp.ne.s32.totalorder %s3947_s9, %s3428_s5  ;;  %s3433_s20 = sshll.u32 %s3586_s28, 4  ;;  %s3434_s20 = int_to_ptr.vmem [resolvable:$false] %s3433_s20 }
  0xcf   : > { %s3435_s1 = scalar_lea.vmem %s3434_s20, 4096  ;;  %p3436_p11 = scmp.lt.s32.totalorder %s3947_s9, %s3434_s20 }
  0xd0   : > { %p3431_p2 = pnand %p3429_p3, %p3415_p0  ;;  %p3437_p8 = scmp.lt.s32.totalorder %s3435_s1, %s3428_s5 }
  0xd2   : > { %p3432_p1 = pneg %p3431_p2  ;;  %p3438_p9 = por %p3437_p8, %p3436_p11 }
  0xd4   : > { %p3439_p10 = pnand %p3438_p9, %p3432_p1 }
  0xd6   : > { %3442 = shalt.err (!%p3439_p10)
}
  0xd7   : > { %s4516_s8 = smov 8   ;;  %s4517_s2 = smov 128  }
  0xd8   : > { %3129 = dma.hbm_to_vmem [thread:$0]  (!%p3951_p5), %s3945_s7, 2048, %s3947_s9, %s3955_s11, %s4517_s2, %s4517_s2, %s4516_s8  }
  0xd9   : > { %s4518_s3 = sld [smem:[#allocation24_spill]] }
  0xdf   : > { %p4519_p0 = scmp.ne.s32.totalorder %s4518_s3, 0 }
  0xe0   : > { %s456_s18 = sand.u32 (!%p4519_p0), 1, %s3553_s25  }
  0xe1   : > { %454 = sbr.rel (%p4519_p0) target bundleno = 3517 (0xdbd), region = 68  ;;  %s2051_s6 = sshll.u32 (!%p4519_p0), %s456_s18, 7 }
  0xe2   : > { %s457_s5 = scalar_lea.sflag (!%p4519_p0), [#allocation6], %s456_s18  ;;  %s3989_s28 = scalar_lea.vmem (!%p4519_p0), [#allocation5], %s2051_s6 }
  0xe8   : > { %3516 = dma.done.wait (%p3903_p4), %s457_s5, 2048  }
  0xe9   : > { %3518 = vsyncadd (%p3903_p4), %s457_s5, 4294965248  ;;  %p4520_p11 = scmp.ne.s32.totalorder %s4498_s15, 0 }
  0xeb   : > { %3520 = dma.done.wait (%p4520_p11), [#allocation9], 2560  }
  0xec   : > { %3522 = vsyncadd (%p4520_p11), [#allocation9], 4294964736 }
  0xed   : > { %3524 = dma.done.wait (%p4520_p11), [#allocation12], 4096  }
  0xee   : > { %3526 = vsyncadd (%p4520_p11), [#allocation12], 4294963200 }
  0xef   : > { %3528 = dma.done.wait (%p4520_p11), [#allocation15], 2048  }
  0xf0   : > { %3530 = vsyncadd (%p4520_p11), [#allocation15], 4294965248  ;;  %s518_s7 = sand.u32 1, %s3541_s22   ;;  %s4521_s12 = sld [smem:[#allocation22_spill]] }
  0xf1   : > { %s4010_s9 = sshll.u32 %s518_s7, 3 }
  0xf2   : > { %s520_s14 = scalar_lea.vmem [#allocation16], %s4010_s9 }
  0xf6   : > { %p2058_p4 = scmp.ne.s32.totalorder %s4521_s12, 0 }
  0xf7   : > { %vm526_vm0 = vcmask (!%p2058_p4), 7168   ;;  %v3587_v0 = vmov (!%p2058_p4), -inf   ;;  %v3588_v1 = vmov (!%p2058_p4), 0.0  }
  0xf8   : > { %525 = sbr.rel (%p2058_p4) target bundleno = 255 (0xff), region = 96  ;;  %527 = vst.msk [vmem:[#allocation2] sm:$0xff] (!%p2058_p4), %vm526_vm0, %v3587_v0  ;;  %528 = vst.msk [vmem:[#allocation2 + $0x8] sm:$0xff] (!%p2058_p4), %vm526_vm0, %v3587_v0 }
  0xf9   : > { %529 = vst.msk [vmem:[#allocation2 + $0x10] sm:$0xff] (!%p2058_p4), %vm526_vm0, %v3587_v0  ;;  %530 = vst.msk [vmem:[#allocation2 + $0x18] sm:$0xff] (!%p2058_p4), %vm526_vm0, %v3587_v0 }
  0xfa   : > { %531 = vst.msk [vmem:[#allocation3] sm:$0xff] (!%p2058_p4), %vm526_vm0, %v3588_v1  ;;  %532 = vst.msk [vmem:[#allocation3 + $0x8] sm:$0xff] (!%p2058_p4), %vm526_vm0, %v3588_v1 }
  0xfb   : > { %533 = vst.msk [vmem:[#allocation3 + $0x10] sm:$0xff] (!%p2058_p4), %vm526_vm0, %v3588_v1  ;;  %534 = vst.msk [vmem:[#allocation3 + $0x18] sm:$0xff] (!%p2058_p4), %vm526_vm0, %v3588_v1 }
  0xfc   : > { %535 = vst [vmem:[#allocation4] sm:$0xff] (!%p2058_p4), %v3588_v1 }
  0xff PF: > { %v552_v2 = vld [vmem:[#allocation10] sm:$0xff]  ;;  %v553_v3 = vld [vmem:[#allocation10 + $0x8] sm:$0xff]  ;;  %v554_v4 = vld [vmem:[#allocation10 + $0x10] sm:$0xff]  ;;  %v3589_v42 = vmov 0.0|0.0   ;;  %vm3590_vm1 = vmmov 0   ;;  %v3591_v43 = vmov 0.0  }
 0x100   : > { %v2782_v5 = vpack.c.bf16 %v553_v3, %v552_v2  ;;  %v555_v6 = vld [vmem:[#allocation10 + $0x18] sm:$0xff]  ;;  %v556_v8 = vld [vmem:[#allocation10 + $0x20] sm:$0xff]  ;;  %v557_v9 = vld [vmem:[#allocation10 + $0x28] sm:$0xff]  ;;  %s4522_s20 = sld [smem:[#allocation28_spill]]  ;;  %s4523_s2 = sld [smem:[#allocation30_spill]]  ;;  %vm980_vm2 = vcmask 7168  }
 0x101   : > { %v2786_v7 = vpack.c.bf16 %v555_v6, %v554_v4  ;;  %v2790_v10 = vpack.c.bf16 %v557_v9, %v556_v8  ;;  %v536_v11 = vld [vmem:[%s3989_s28] sm:$0xff]  ;;  %v558_v12 = vld [vmem:[#allocation10 + $0x30] sm:$0xff]  ;;  %v559_v13 = vld [vmem:[#allocation10 + $0x38] sm:$0xff]  ;;  %s4524_s6 = sld [smem:[#allocation31_spill]]  ;;  %s4525_s1 = sld [smem:[#allocation22_spill]] }
 0x102   : > { %2783 = vmatprep.subr.bf16.mxu0 %v2782_v5  ;;  %2352 = vmatprep.mubr.f32.mxu0 %v536_v11  ;;  %v2794_v14 = vpack.c.bf16 %v559_v13, %v558_v12  ;;  %v560_v15 = vld [vmem:[#allocation10 + $0x40] sm:$0xff]  ;;  %v561_v16 = vld [vmem:[#allocation10 + $0x48] sm:$0xff]  ;;  %v562_v18 = vld [vmem:[#allocation10 + $0x50] sm:$0xff] }
 0x103   : > { %2785 = vmatpush3.bf16.msra.mxu0 %v2782_v5  ;;  %2408 = vmatprep.mubr.f32.mxu1 %v536_v11  ;;  %v2798_v17 = vpack.c.bf16 %v561_v16, %v560_v15  ;;  %v563_v19 = vld [vmem:[#allocation10 + $0x58] sm:$0xff]  ;;  %v564_v21 = vld [vmem:[#allocation10 + $0x60] sm:$0xff]  ;;  %v565_v22 = vld [vmem:[#allocation10 + $0x68] sm:$0xff] }
 0x104   : > { %2787 = vmatprep.subr.bf16.mxu0 %v2786_v7  ;;  %v2802_v20 = vpack.c.bf16 %v563_v19, %v562_v18  ;;  %v2806_v23 = vpack.c.bf16 %v565_v22, %v564_v21  ;;  %v566_v24 = vld [vmem:[#allocation10 + $0x70] sm:$0xff]  ;;  %v567_v25 = vld [vmem:[#allocation10 + $0x78] sm:$0xff]  ;;  %v4016_v27 = vld [vmem:[%s3989_s28 + $0x8] sm:$0xff] }
 0x105   : > { %v2810_v26 = vpack.c.bf16 %v567_v25, %v566_v24  ;;  %v4019_v28 = vld [vmem:[%s3989_s28 + $0x10] sm:$0xff]  ;;  %v4024_v29 = vld [vmem:[%s3989_s28 + $0x18] sm:$0xff]  ;;  %v4027_v30 = vld [vmem:[%s3989_s28 + $0x20] sm:$0xff] }
 0x106   : > { %v4032_v31 = vld [vmem:[%s3989_s28 + $0x28] sm:$0xff]  ;;  %v4035_v32 = vld [vmem:[%s3989_s28 + $0x30] sm:$0xff]  ;;  %v4040_v33 = vld [vmem:[%s3989_s28 + $0x38] sm:$0xff] }
 0x107   : > { %2789 = vmatpush3.bf16.msra.mxu0 %v2786_v7  ;;  %v4043_v34 = vld [vmem:[%s3989_s28 + $0x40] sm:$0xff]  ;;  %v4048_v35 = vld [vmem:[%s3989_s28 + $0x48] sm:$0xff]  ;;  %v4051_v36 = vld [vmem:[%s3989_s28 + $0x50] sm:$0xff]  ;;  %p2072_p1 = scmp.ne.s32.totalorder %s4525_s1, 1 }
 0x108   : > { %2791 = vmatprep.subr.bf16.mxu0 %v2790_v10  ;;  %v4056_v37 = vld [vmem:[%s3989_s28 + $0x58] sm:$0xff]  ;;  %v4059_v38 = vld [vmem:[%s3989_s28 + $0x60] sm:$0xff]  ;;  %v4064_v39 = vld [vmem:[%s3989_s28 + $0x68] sm:$0xff]  ;;  %vm3595_vm3 = vmmov (!%p2072_p1), 0   ;;  %s4526_s3 = sld [smem:[#allocation31_spill]] (!%p2072_p1)  ;;  %s4527_s1 = sld [smem:[#allocation33_spill]] (!%p2072_p1) }
 0x109   : > { %v4067_v40 = vld [vmem:[%s3989_s28 + $0x70] sm:$0xff]  ;;  %v4072_v41 = vld [vmem:[%s3989_s28 + $0x78] sm:$0xff]  ;;  %v888_v21 = vld [vmem:[#allocation8] sm:$0xff]  ;;  %s4529_s5 = sld [smem:[#allocation35_spill]] (!%p2072_p1) }
 0x10a   : > { %v2059_v44 = vld [vmem:[%s4522_s20] ss:$0 sm:$0xff]  ;;  %v720_v22 = vld [vmem:[#allocation11] sm:$0xff]  ;;  %v722_v25 = vld [vmem:[#allocation11 + $0x10] sm:$0xff] }
 0x10b   : > { %2793 = vmatpush3.bf16.msra.mxu0 %v2790_v10 }
 0x10c   : > { %2795 = vmatprep.subr.bf16.mxu0 %v2794_v14 }
 0x10f   : > { %2797 = vmatpush3.bf16.msra.mxu0 %v2794_v14 }
 0x110   : > { %2799 = vmatprep.subr.bf16.mxu0 %v2798_v17 }
 0x113   : > { %2801 = vmatpush3.bf16.msra.mxu0 %v2798_v17 }
 0x114   : > { %2803 = vmatprep.subr.bf16.mxu0 %v2802_v20 }
 0x117   : > { %2805 = vmatpush3.bf16.msra.mxu0 %v2802_v20 }
 0x118   : > { %2807 = vmatprep.subr.bf16.mxu0 %v2806_v23 }
 0x11b   : > { %2809 = vmatpush3.bf16.msra.mxu0 %v2806_v23  ;;  %v721_v23 = vld [vmem:[#allocation11 + $0x8] sm:$0xff] }
 0x11c   : > { %2811 = vmatprep.subr.bf16.mxu0 %v2810_v26  ;;  %v2814_v24 = vpack.c.bf16 %v721_v23, %v720_v22 }
 0x11e   : > { %2815 = vmatprep.subr.bf16.mxu1 %v2814_v24 }
 0x11f   : > { %2813 = vmatpush3.bf16.msra.mxu0 %v2810_v26  ;;  %v723_v26 = vld [vmem:[#allocation11 + $0x18] sm:$0xff]  ;;  %2817 = vmatpush3.bf16.msra.mxu1 %v2814_v24 }
 0x120   : > { %2846 = vmatprep.subr.bf16.mxu0 %v3589_v42 }
 0x122   : > { %2353 = vmatmul.mubr.f32.vlgmr.msra.gmra.mrb[0].mxu0 %v4016_v27 }
 0x123   : > { %2355 = vmatprep.mubr.f32.mxu0 %v4019_v28 }
 0x126   : > { %2356 = vmatmul.mubr.f32.gmra.mrb[2].mxu0 %v4024_v29 }
 0x127   : > { %2358 = vmatprep.mubr.f32.mxu0 %v4027_v30 }
 0x12a   : > { %2359 = vmatmul.mubr.f32.gmra.mrb[4].mxu0 %v4032_v31 }
 0x12b   : > { %2361 = vmatprep.mubr.f32.mxu0 %v4035_v32 }
 0x12e   : > { %2362 = vmatmul.mubr.f32.gmra.mrb[6].mxu0 %v4040_v33 }
 0x12f   : > { %2364 = vmatprep.mubr.f32.mxu0 %v4043_v34 }
 0x132   : > { %2365 = vmatmul.mubr.f32.gmra.mrb[8].mxu0 %v4048_v35 }
 0x133   : > { %2367 = vmatprep.mubr.f32.mxu0 %v4051_v36 }
 0x136   : > { %2368 = vmatmul.mubr.f32.gmra.mrb[10].mxu0 %v4056_v37 }
 0x137   : > { %2370 = vmatprep.mubr.f32.mxu0 %v4059_v38 }
 0x13a   : > { %2371 = vmatmul.mubr.f32.gmra.mrb[12].mxu0 %v4064_v39 }
 0x13b   : > { %2373 = vmatprep.mubr.f32.mxu0 %v4067_v40 }
 0x13e   : > { %2374 = vmatmul.mubr.f32.gmra.mrb[14].mxu0 %v4072_v41 }
 0x13f   : > { %2464 = vmatprep.mubr.msk.f32.mxu0 %vm3590_vm1, %v3591_v43 }
 0x1f5   : > { %v2354_v45 = vpop.f32.mrb[0].mxu0 }
 0x1f6   : > { %v647_v46 = vadd.f32 %v2354_v45, %v2059_v44  ;;  %v641_v47 = vpop.f32.mrb[1].mxu0  ;;  %v2818_v45 = vpack.c.bf16 %v723_v26, %v722_v25  ;;  %v4183_v25 = vld [vmem:[#allocation2] sm:$0xff] }
 0x1f7   : > { %v642_v48 = vadd.f32 %v2059_v44, %v641_v47 }
 0x1f8   : > { %2819 = vmatprep.subr.bf16.mxu1 %v2818_v45 }
 0x1f9   : > { %v4081_v49 = vpack.c.bf16 %v647_v46, %v642_v48  ;;  %v2357_v50 = vpop.f32.mrb[2].mxu0  ;;  %v725_v46 = vld [vmem:[#allocation11 + $0x28] sm:$0xff]  ;;  %v726_v48 = vld [vmem:[#allocation11 + $0x30] sm:$0xff]  ;;  %2821 = vmatpush3.bf16.msra.mxu1 %v2818_v45 }
 0x1fa   : > { %v657_v51 = vadd.f32 %v2357_v50, %v2059_v44  ;;  %v651_v52 = vpop.f32.mrb[3].mxu0  ;;  %v727_v50 = vld [vmem:[#allocation11 + $0x38] sm:$0xff] }
 0x1fb   : > { %2848 = vmatpush3.bf16.xpose.msra.mxu0 %v4081_v49  ;;  %v652_v53 = vadd.f32 %v2059_v44, %v651_v52  ;;  %v728_v52 = vld [vmem:[#allocation11 + $0x40] sm:$0xff] }
 0x1fc   : > { %2849 = vmatprep.subr.bf16.mxu0 %v3589_v42 }
 0x1fd   : > { %v4085_v54 = vpack.c.bf16 %v657_v51, %v652_v53  ;;  %v2360_v55 = vpop.f32.mrb[4].mxu0  ;;  %v2826_v51 = vpack.c.bf16 %v727_v50, %v726_v48  ;;  %v729_v53 = vld [vmem:[#allocation11 + $0x48] sm:$0xff] }
 0x1fe   : > { %v667_v56 = vadd.f32 %v2360_v55, %v2059_v44  ;;  %v661_v57 = vpop.f32.mrb[5].mxu0  ;;  %v2830_v55 = vpack.c.bf16 %v729_v53, %v728_v52 }
 0x1ff   : > { %v662_v58 = vadd.f32 %v2059_v44, %v661_v57  ;;  %v731_v57 = vld [vmem:[#allocation11 + $0x58] sm:$0xff] }
 0x201   : > { %v4087_v59 = vpack.c.bf16 %v667_v56, %v662_v58  ;;  %v2363_v60 = vpop.f32.mrb[6].mxu0  ;;  %v730_v56 = vld [vmem:[#allocation11 + $0x50] sm:$0xff] }
 0x202   : > { %v677_v61 = vadd.f32 %v2363_v60, %v2059_v44  ;;  %v671_v62 = vpop.f32.mrb[7].mxu0  ;;  %v2834_v58 = vpack.c.bf16 %v731_v57, %v730_v56  ;;  %v732_v60 = vld [vmem:[#allocation11 + $0x60] sm:$0xff] }
 0x203   : > { %2851 = vmatpush3.bf16.xpose.msra.mxu0 %v4085_v54  ;;  %v672_v63 = vadd.f32 %v2059_v44, %v671_v62 }
 0x204   : > { %2852 = vmatprep.subr.bf16.mxu0 %v3589_v42 }
 0x205   : > { %v4091_v0 = vpack.c.bf16 %v677_v61, %v672_v63  ;;  %v2366_v1 = vpop.f32.mrb[8].mxu0  ;;  %v733_v61 = vld [vmem:[#allocation11 + $0x68] sm:$0xff]  ;;  %v734_v63 = vld [vmem:[#allocation11 + $0x70] sm:$0xff] }
 0x206   : > { %v687_v2 = vadd.f32 %v2366_v1, %v2059_v44  ;;  %v681_v3 = vpop.f32.mrb[9].mxu0  ;;  %v2838_v62 = vpack.c.bf16 %v733_v61, %v732_v60  ;;  %v735_v1 = vld [vmem:[#allocation11 + $0x78] sm:$0xff] }
 0x207   : > { %v682_v4 = vadd.f32 %v2059_v44, %v681_v3 }
 0x209   : > { %v4093_v5 = vpack.c.bf16 %v687_v2, %v682_v4  ;;  %v2369_v6 = vpop.f32.mrb[10].mxu0  ;;  %v2842_v2 = vpack.c.bf16 %v735_v1, %v734_v63  ;;  %v1073_v1 = vld [vmem:[#allocation8 + $0x8] sm:$0xff] }
 0x20a   : > { %v697_v7 = vadd.f32 %v2369_v6, %v2059_v44  ;;  %v691_v8 = vpop.f32.mrb[11].mxu0 }
 0x20b   : > { %2854 = vmatpush3.bf16.xpose.msra.mxu0 %v4087_v59  ;;  %v692_v9 = vadd.f32 %v2059_v44, %v691_v8 }
 0x20c   : > { %2855 = vmatprep.subr.bf16.mxu0 %v3589_v42 }
 0x20d   : > { %v4097_v10 = vpack.c.bf16 %v697_v7, %v692_v9  ;;  %v2372_v11 = vpop.f32.mrb[12].mxu0 }
 0x20e   : > { %v707_v12 = vadd.f32 %v2372_v11, %v2059_v44  ;;  %v701_v13 = vpop.f32.mrb[13].mxu0 }
 0x20f   : > { %v702_v14 = vadd.f32 %v2059_v44, %v701_v13 }
 0x211   : > { %v4099_v15 = vpack.c.bf16 %v707_v12, %v702_v14  ;;  %v2375_v16 = vpop.f32.mrb[14].mxu0 }
 0x212   : > { %v717_v17 = vadd.f32 %v2375_v16, %v2059_v44  ;;  %v711_v18 = vpop.f32.mrb[15].mxu0 }
 0x213   : > { %2857 = vmatpush3.bf16.xpose.msra.mxu0 %v4091_v0  ;;  %v712_v19 = vadd.f32 %v2059_v44, %v711_v18  ;;  %v724_v44 = vld [vmem:[#allocation11 + $0x20] sm:$0xff] }
 0x214   : > { %2858 = vmatprep.subr.bf16.mxu0 %v3589_v42  ;;  %v2822_v47 = vpack.c.bf16 %v725_v46, %v724_v44 }
 0x215   : > { %v4103_v20 = vpack.c.bf16 %v717_v17, %v712_v19 }
 0x216   : > { %2823 = vmatprep.subr.bf16.mxu1 %v2822_v47 }
 0x217   : > { %2825 = vmatpush3.bf16.msra.mxu1 %v2822_v47 }
 0x218   : > { %2827 = vmatprep.subr.bf16.mxu1 %v2826_v51 }
 0x21b   : > { %2860 = vmatpush3.bf16.xpose.msra.mxu0 %v4093_v5  ;;  %2829 = vmatpush3.bf16.msra.mxu1 %v2826_v51 }
 0x21c   : > { %2861 = vmatprep.subr.bf16.mxu0 %v3589_v42  ;;  %2831 = vmatprep.subr.bf16.mxu1 %v2830_v55 }
 0x21f   : > { %2833 = vmatpush3.bf16.msra.mxu1 %v2830_v55 }
 0x220   : > { %2835 = vmatprep.subr.bf16.mxu1 %v2834_v58 }
 0x223   : > { %2863 = vmatpush3.bf16.xpose.msra.mxu0 %v4097_v10  ;;  %2837 = vmatpush3.bf16.msra.mxu1 %v2834_v58 }
 0x224   : > { %2864 = vmatprep.subr.bf16.mxu0 %v3589_v42  ;;  %2839 = vmatprep.subr.bf16.mxu1 %v2838_v62 }
 0x227   : > { %2841 = vmatpush3.bf16.msra.mxu1 %v2838_v62 }
 0x228   : > { %2843 = vmatprep.subr.bf16.mxu1 %v2842_v2 }
 0x22b   : > { %2866 = vmatpush3.bf16.xpose.msra.mxu0 %v4099_v15  ;;  %2845 = vmatpush3.bf16.msra.mxu1 %v2842_v2 }
 0x22c   : > { %2867 = vmatprep.subr.bf16.mxu0 %v3589_v42  ;;  %2870 = vmatprep.subr.bf16.mxu1 %v3589_v42 }
 0x22e   : > { %2409 = vmatmul.mubr.f32.vlgmr.msra.gmra.mrb[0].mxu1 %v4016_v27 }
 0x22f   : > { %2411 = vmatprep.mubr.f32.mxu1 %v4019_v28 }
 0x232   : > { %2412 = vmatmul.mubr.f32.gmra.mrb[2].mxu1 %v4024_v29  ;;  %v3592_v29 = vmov 0  }
 0x233   : > { %2869 = vmatpush3.bf16.xpose.msra.mxu0 %v4103_v20  ;;  %2414 = vmatprep.mubr.f32.mxu1 %v4027_v30  ;;  %v4139_v30 = vld [vmem:[%s4523_s2] ss:$0 sm:$0xff] }
 0x234   : > { %2918 = vmatprep.subr.bf16.mxu0 %v3589_v42  ;;  %3251 = vset.pattern.permute.xlu0 %v3592_v29 }
 0x235   : > { %3252 = vset.pattern.permute.xlu1 %v3592_v29 }
 0x236   : > { %2415 = vmatmul.mubr.f32.gmra.mrb[4].mxu1 %v4032_v31 }
 0x237   : > { %2417 = vmatprep.mubr.f32.mxu1 %v4035_v32 }
 0x23a   : > { %2465 = vmatmul.mubr.f32.vlgmr.msra.gmra.mrb[16].mxu0 %v888_v21  ;;  %2418 = vmatmul.mubr.f32.gmra.mrb[6].mxu1 %v4040_v33 }
 0x23b   : > { %2569 = vmatprep.mubr.msk.f32.mxu0 %vm3590_vm1, %v3591_v43  ;;  %2420 = vmatprep.mubr.f32.mxu1 %v4043_v34 }
 0x23e   : > { %2421 = vmatmul.mubr.f32.gmra.mrb[8].mxu1 %v4048_v35 }
 0x23f   : > { %2423 = vmatprep.mubr.f32.mxu1 %v4051_v36 }
 0x242   : > { %2424 = vmatmul.mubr.f32.gmra.mrb[10].mxu1 %v4056_v37 }
 0x243   : > { %2426 = vmatprep.mubr.f32.mxu1 %v4059_v38 }
 0x246   : > { %2427 = vmatmul.mubr.f32.gmra.mrb[12].mxu1 %v4064_v39 }
 0x247   : > { %2429 = vmatprep.mubr.f32.mxu1 %v4067_v40 }
 0x24a   : > { %2430 = vmatmul.mubr.f32.gmra.mrb[14].mxu1 %v4072_v41 }
 0x24b   : > { %2499 = vmatprep.mubr.msk.f32.mxu1 %vm3590_vm1, %v3591_v43 }
 0x301   : > { %v2410_v31 = vpop.f32.mrb[0].mxu1 }
 0x302   : > { %v815_v32 = vadd.f32 %v2410_v31, %v4139_v30  ;;  %v809_v33 = vpop.f32.mrb[1].mxu1 }
 0x303   : > { %v810_v34 = vadd.f32 %v4139_v30, %v809_v33 }
 0x305   : > { %v4143_v35 = vpack.c.bf16 %v815_v32, %v810_v34  ;;  %v2413_v36 = vpop.f32.mrb[2].mxu1 }
 0x306   : > { %v825_v37 = vadd.f32 %v2413_v36, %v4139_v30  ;;  %v819_v38 = vpop.f32.mrb[3].mxu1 }
 0x307   : > { %v820_v39 = vadd.f32 %v4139_v30, %v819_v38  ;;  %2872 = vmatpush3.bf16.msra.mxu1 %v4143_v35  ;;  %2920 = vmatpush3.bf16.msra.mxu0 %v4143_v35 }
 0x308   : > { %2873 = vmatprep.subr.bf16.mxu1 %v3589_v42  ;;  %2921 = vmatprep.subr.bf16.mxu0 %v3589_v42 }
 0x309   : > { %v4151_v40 = vpack.c.bf16 %v825_v37, %v820_v39  ;;  %v2416_v41 = vpop.f32.mrb[4].mxu1  ;;  %v1260_v39 = vld [vmem:[#allocation8 + $0x10] sm:$0xff] }
 0x30a   : > { %v835_v3 = vadd.f32 %v2416_v41, %v4139_v30  ;;  %v829_v4 = vpop.f32.mrb[5].mxu1 }
 0x30b   : > { %v830_v6 = vadd.f32 %v4139_v30, %v829_v4  ;;  %2875 = vmatpush3.bf16.msra.mxu1 %v4151_v40  ;;  %2923 = vmatpush3.bf16.msra.mxu0 %v4151_v40  ;;  %v1334_v4 = vld [vmem:[#allocation2 + $0x10] sm:$0xff] }
 0x30c   : > { %2876 = vmatprep.subr.bf16.mxu1 %v3589_v42  ;;  %2924 = vmatprep.subr.bf16.mxu0 %v3589_v42 }
 0x30d   : > { %v4133_v27 = vpop.f32.mrb[16].mxu0  ;;  %v4159_v7 = vpack.c.bf16 %v835_v3, %v830_v6  ;;  %v2419_v8 = vpop.f32.mrb[6].mxu1 }
 0x30e   : > { %962 = vmax.xlane.f32.xlu0 %v4133_v27  ;;  %v2466_v28 = vpop.f32.mrb[17].mxu0  ;;  %v845_v9 = vadd.f32 %v2419_v8, %v4139_v30  ;;  %v839_v11 = vpop.f32.mrb[7].mxu1 }
 0x30f   : > { %v840_v12 = vadd.f32 %v4139_v30, %v839_v11  ;;  %2878 = vmatpush3.bf16.msra.mxu1 %v4159_v7  ;;  %2926 = vmatpush3.bf16.msra.mxu0 %v4159_v7 }
 0x310   : > { %2879 = vmatprep.subr.bf16.mxu1 %v3589_v42  ;;  %2927 = vmatprep.subr.bf16.mxu0 %v3589_v42 }
 0x311   : > { %v4167_v13 = vpack.c.bf16 %v845_v9, %v840_v12  ;;  %v2422_v14 = vpop.f32.mrb[8].mxu1 }
 0x312   : > { %v855_v16 = vadd.f32 %v2422_v14, %v4139_v30  ;;  %v849_v17 = vpop.f32.mrb[9].mxu1 }
 0x313   : > { %v850_v18 = vadd.f32 %v4139_v30, %v849_v17  ;;  %2881 = vmatpush3.bf16.msra.mxu1 %v4167_v13  ;;  %2929 = vmatpush3.bf16.msra.mxu0 %v4167_v13  ;;  %v2062_v17 = vld [vmem:[%s4524_s6] ss:$0 sm:$0xff] }
 0x314   : > { %2882 = vmatprep.subr.bf16.mxu1 %v3589_v42  ;;  %2930 = vmatprep.subr.bf16.mxu0 %v3589_v42 }
 0x315   : > { %v4175_v19 = vpack.c.bf16 %v855_v16, %v850_v18  ;;  %v2425_v21 = vpop.f32.mrb[10].mxu1 }
 0x316   : > { %v865_v22 = vadd.f32 %v2425_v21, %v4139_v30  ;;  %v859_v23 = vpop.f32.mrb[11].mxu1  ;;  %v1053_v21 = vld [vmem:[#allocation4] sm:$0xff] }
 0x317   : > { %v860_v24 = vadd.f32 %v4139_v30, %v859_v23  ;;  %2884 = vmatpush3.bf16.msra.mxu1 %v4175_v19  ;;  %2932 = vmatpush3.bf16.msra.mxu0 %v4175_v19 }
 0x318   : > { %2885 = vmatprep.subr.bf16.mxu1 %v3589_v42  ;;  %2933 = vmatprep.subr.bf16.mxu0 %v3589_v42 }
 0x319   : > { %v4185_v26 = vpack.c.bf16 %v865_v22, %v860_v24  ;;  %v2428_v44 = vpop.f32.mrb[12].mxu1 }
 0x31a   : > { %v875_v45 = vadd.f32 %v2428_v44, %v4139_v30  ;;  %v869_v46 = vpop.f32.mrb[13].mxu1 }
 0x31b   : > { %v870_v48 = vadd.f32 %v4139_v30, %v869_v46  ;;  %2887 = vmatpush3.bf16.msra.mxu1 %v4185_v26  ;;  %2935 = vmatpush3.bf16.msra.mxu0 %v4185_v26  ;;  %v1149_v46 = vld [vmem:[#allocation3 + $0x8] sm:$0xff] }
 0x31c   : > { %2888 = vmatprep.subr.bf16.mxu1 %v3589_v42  ;;  %2936 = vmatprep.subr.bf16.mxu0 %v3589_v42 }
 0x31d   : > { %v4196_v51 = vpack.c.bf16 %v875_v45, %v870_v48  ;;  %v2431_v52 = vpop.f32.mrb[14].mxu1 }
 0x31e   : > { %v885_v55 = vadd.f32 %v2431_v52, %v4139_v30  ;;  %v879_v56 = vpop.f32.mrb[15].mxu1 }
 0x31f   : > { %v880_v57 = vadd.f32 %v4139_v30, %v879_v56  ;;  %2890 = vmatpush3.bf16.msra.mxu1 %v4196_v51  ;;  %2938 = vmatpush3.bf16.msra.mxu0 %v4196_v51  ;;  %v4257_v30 = vld [vmem:[#allocation2 + $0x8] sm:$0xff] }
 0x320   : > { %2891 = vmatprep.subr.bf16.mxu1 %v3589_v42  ;;  %2939 = vmatprep.subr.bf16.mxu0 %v3589_v42 }
 0x321   : > { %v4209_v58 = vpack.c.bf16 %v885_v55, %v880_v57 }
 0x323   : > { %2893 = vmatpush3.bf16.msra.mxu1 %v4209_v58  ;;  %2941 = vmatpush3.bf16.msra.mxu0 %v4209_v58 }
 0x324   : > { %2894 = vmatprep.subr.bf16.mxu1 %v3589_v42  ;;  %2942 = vmatprep.subr.bf16.mxu0 %v3589_v42 }
 0x39b   : > { %v963_v47 = vpop.xlane.xlu0 %962 }
 0x39c   : > { %v4192_v50 = vmax.f32 %v4183_v25, %v963_v47 }
 0x39e   : > { %v965_v53 = vsub.f32 %v4183_v25, %v4192_v50  ;;  %982 = vst.msk [vmem:[#allocation2] sm:$0xff] %vm980_vm2, %v4192_v50  ;;  %970 = vperm.xlu0 %3251, %v4192_v50  }
 0x41d   : > { %v971_v60 = vpop.permute.xlu0 %970 }
 0x41e   : > { %v973_v61 = vsub.f32 %v4133_v27, %v971_v60 }
 0x420   : > { %v974_v62 = vmul.f32 1.442695, %v973_v61 }
 0x422   : > { %3253 = vpow2.f32 %v974_v62 }
 0x42c   : > { %v4216_v63 = vpop.eup %3253 }
 0x42d   : > { %2500 = vmatmul.mubr.f32.vlgmr.msra.gmra.mrb[16].mxu1 %v4216_v63 }
 0x42e   : > { %2896 = vmatpush3.bf16.xpose.msra.mxu1 %v4081_v49  ;;  %2534 = vmatprep.mubr.msk.f32.mxu1 %vm3590_vm1, %v3591_v43 }
 0x42f   : > { %2897 = vmatprep.subr.bf16.mxu1 %v3589_v42 }
 0x436   : > { %2899 = vmatpush3.bf16.xpose.msra.mxu1 %v4085_v54 }
 0x437   : > { %2900 = vmatprep.subr.bf16.mxu1 %v3589_v42 }
 0x43e   : > { %2902 = vmatpush3.bf16.xpose.msra.mxu1 %v4087_v59 }
 0x43f   : > { %2903 = vmatprep.subr.bf16.mxu1 %v3589_v42 }
 0x446   : > { %2905 = vmatpush3.bf16.xpose.msra.mxu1 %v4091_v0 }
 0x447   : > { %2906 = vmatprep.subr.bf16.mxu1 %v3589_v42 }
 0x44e   : > { %2908 = vmatpush3.bf16.xpose.msra.mxu1 %v4093_v5 }
 0x44f   : > { %2909 = vmatprep.subr.bf16.mxu1 %v3589_v42 }
 0x456   : > { %2911 = vmatpush3.bf16.xpose.msra.mxu1 %v4097_v10 }
 0x457   : > { %2912 = vmatprep.subr.bf16.mxu1 %v3589_v42 }
 0x45e   : > { %2914 = vmatpush3.bf16.xpose.msra.mxu1 %v4099_v15 }
 0x45f   : > { %2915 = vmatprep.subr.bf16.mxu1 %v3589_v42 }
 0x466   : > { %2917 = vmatpush3.bf16.xpose.msra.mxu1 %v4103_v20 }
 0x467   : > { %2966 = vmatprep.subr.bf16.mxu1 %v3589_v42 }
 0x46d   : > { %2535 = vmatmul.mubr.f32.vlgmr.msra.gmra.mrb[18].mxu1 %v1073_v1 }
 0x46e   : > { %2968 = vmatpush3.bf16.msra.mxu1 %v4143_v35  ;;  %2639 = vmatprep.mubr.msk.f32.mxu1 %vm3590_vm1, %v3591_v43 }
 0x46f   : > { %2969 = vmatprep.subr.bf16.mxu1 %v3589_v42 }
 0x472   : > { %2971 = vmatpush3.bf16.msra.mxu1 %v4151_v40 }
 0x473   : > { %2972 = vmatprep.subr.bf16.mxu1 %v3589_v42 }
 0x476   : > { %2974 = vmatpush3.bf16.msra.mxu1 %v4159_v7 }
 0x477   : > { %2975 = vmatprep.subr.bf16.mxu1 %v3589_v42 }
 0x47a   : > { %2977 = vmatpush3.bf16.msra.mxu1 %v4167_v13 }
 0x47b   : > { %2978 = vmatprep.subr.bf16.mxu1 %v3589_v42 }
 0x47e   : > { %2980 = vmatpush3.bf16.msra.mxu1 %v4175_v19 }
 0x47f   : > { %2981 = vmatprep.subr.bf16.mxu1 %v3589_v42 }
 0x482   : > { %2983 = vmatpush3.bf16.msra.mxu1 %v4185_v26 }
 0x483   : > { %2984 = vmatprep.subr.bf16.mxu1 %v3589_v42 }
 0x486   : > { %2986 = vmatpush3.bf16.msra.mxu1 %v4196_v51 }
 0x487   : > { %2987 = vmatprep.subr.bf16.mxu1 %v3589_v42 }
 0x48a   : > { %2989 = vmatpush3.bf16.msra.mxu1 %v4209_v58 }
 0x48b   : > { %2990 = vmatprep.subr.bf16.mxu1 %v3589_v42 }
 0x500   : > { %v4255_v2 = vpop.f32.mrb[16].mxu1 }
 0x501   : > { %v2501_v27 = vpop.f32.mrb[17].mxu1  ;;  %v1069_v23 = vmul.f32 %v2062_v17, %v4255_v2 }
 0x540   : > { %v1142_v28 = vpop.f32.mrb[18].mxu1 }
 0x541   : > { %1150 = vmax.xlane.f32.xlu1 %v1142_v28  ;;  %v2536_v29 = vpop.f32.mrb[19].mxu1 }
 0x5ce   : > { %v1151_v31 = vpop.xlane.xlu1 %1150 }
 0x5cf   : > { %v4260_v32 = vmax.f32 %v4257_v30, %v1151_v31 }
 0x5d1   : > { %v1153_v33 = vsub.f32 %v4257_v30, %v4260_v32  ;;  %1169 = vst.msk [vmem:[#allocation2 + $0x8] sm:$0xff] %vm980_vm2, %v4260_v32  ;;  %1158 = vperm.xlu1 %3252, %v4260_v32   ;;  %v2068_v32 = vld [vmem:[%s4524_s6 + $0x2] ss:$0 sm:$0xff] }
 0x650   : > { %v1159_v34 = vpop.permute.xlu1 %1158 }
 0x651   : > { %v1161_v36 = vsub.f32 %v1142_v28, %v1159_v34  ;;  %v2065_v28 = vld [vmem:[%s4524_s6 + $0x1] ss:$0 sm:$0xff] }
 0x653   : > { %v1162_v37 = vmul.f32 1.442695, %v1161_v36 }
 0x655   : > { %3255 = vpow2.f32 %v1162_v37 }
 0x65f   : > { %v4267_v38 = vpop.eup %3255 }
 0x660   : > { %2570 = vmatmul.mubr.f32.vlgmr.msra.gmra.mrb[18].mxu0 %v4267_v38 }
 0x661   : > { %2944 = vmatpush3.bf16.xpose.msra.mxu0 %v4081_v49  ;;  %2604 = vmatprep.mubr.msk.f32.mxu0 %vm3590_vm1, %v3591_v43 }
 0x662   : > { %2945 = vmatprep.subr.bf16.mxu0 %v3589_v42 }
 0x669   : > { %2947 = vmatpush3.bf16.xpose.msra.mxu0 %v4085_v54 }
 0x66a   : > { %2948 = vmatprep.subr.bf16.mxu0 %v3589_v42 }
 0x671   : > { %2950 = vmatpush3.bf16.xpose.msra.mxu0 %v4087_v59 }
 0x672   : > { %2951 = vmatprep.subr.bf16.mxu0 %v3589_v42 }
 0x679   : > { %2953 = vmatpush3.bf16.xpose.msra.mxu0 %v4091_v0 }
 0x67a   : > { %2954 = vmatprep.subr.bf16.mxu0 %v3589_v42 }
 0x681   : > { %2956 = vmatpush3.bf16.xpose.msra.mxu0 %v4093_v5 }
 0x682   : > { %2957 = vmatprep.subr.bf16.mxu0 %v3589_v42 }
 0x689   : > { %2959 = vmatpush3.bf16.xpose.msra.mxu0 %v4097_v10 }
 0x68a   : > { %2960 = vmatprep.subr.bf16.mxu0 %v3589_v42 }
 0x691   : > { %2962 = vmatpush3.bf16.xpose.msra.mxu0 %v4099_v15 }
 0x692   : > { %2963 = vmatprep.subr.bf16.mxu0 %v3589_v42 }
 0x699   : > { %2965 = vmatpush3.bf16.xpose.msra.mxu0 %v4103_v20 }
 0x69a   : > { %3014 = vmatprep.subr.bf16.mxu0 %v3589_v42 }
 0x6a0   : > { %2605 = vmatmul.mubr.f32.vlgmr.msra.gmra.mrb[20].mxu0 %v1260_v39 }
 0x6a1   : > { %3016 = vmatpush3.bf16.msra.mxu0 %v4143_v35  ;;  %2709 = vmatprep.mubr.msk.f32.mxu0 %vm3590_vm1, %v3591_v43 }
 0x6a2   : > { %3017 = vmatprep.subr.bf16.mxu0 %v3589_v42 }
 0x6a5   : > { %3019 = vmatpush3.bf16.msra.mxu0 %v4151_v40 }
 0x6a6   : > { %3020 = vmatprep.subr.bf16.mxu0 %v3589_v42 }
 0x6a9   : > { %3022 = vmatpush3.bf16.msra.mxu0 %v4159_v7 }
 0x6aa   : > { %3023 = vmatprep.subr.bf16.mxu0 %v3589_v42 }
 0x6ad   : > { %3025 = vmatpush3.bf16.msra.mxu0 %v4167_v13 }
 0x6ae   : > { %3026 = vmatprep.subr.bf16.mxu0 %v3589_v42 }
 0x6b1   : > { %3028 = vmatpush3.bf16.msra.mxu0 %v4175_v19 }
 0x6b2   : > { %3029 = vmatprep.subr.bf16.mxu0 %v3589_v42 }
 0x6b5   : > { %3031 = vmatpush3.bf16.msra.mxu0 %v4185_v26  ;;  %v1154_v26 = vmul.f32 1.442695, %v1153_v33 }
 0x6b6   : > { %3032 = vmatprep.subr.bf16.mxu0 %v3589_v42 }
 0x6b9   : > { %3034 = vmatpush3.bf16.msra.mxu0 %v4196_v51 }
 0x6ba   : > { %3035 = vmatprep.subr.bf16.mxu0 %v3589_v42 }
 0x6bd   : > { %3037 = vmatpush3.bf16.msra.mxu0 %v4209_v58 }
 0x733   : > { %v4305_v35 = vpop.f32.mrb[18].mxu0 }
 0x734   : > { %v2571_v40 = vpop.f32.mrb[19].mxu0  ;;  %v1256_v34 = vmul.f32 %v2065_v28, %v4305_v35  ;;  %v2071_v35 = vld [vmem:[%s4524_s6 + $0x3] ss:$0 sm:$0xff] }
 0x773   : > { %v1329_v41 = vpop.f32.mrb[20].mxu0 }
 0x774   : > { %1337 = vmax.xlane.f32.xlu1 %v1329_v41  ;;  %v2606_v3 = vpop.f32.mrb[21].mxu0 }
 0x801   : > { %v1338_v6 = vpop.xlane.xlu1 %1337 }
 0x802   : > { %v1339_v7 = vmax.f32 %v1334_v4, %v1338_v6 }
 0x804   : > { %v1340_v8 = vsub.f32 %v1334_v4, %v1339_v7  ;;  %1356 = vst.msk [vmem:[#allocation2 + $0x10] sm:$0xff] %vm980_vm2, %v1339_v7  ;;  %1345 = vperm.xlu0 %3251, %v1339_v7   ;;  %v1336_v4 = vld [vmem:[#allocation3 + $0x10] sm:$0xff] }
 0x806   : > { %v1341_v44 = vmul.f32 1.442695, %v1340_v8 }
 0x883   : > { %v1346_v9 = vpop.permute.xlu0 %1345 }
 0x884   : > { %v1348_v11 = vsub.f32 %v1329_v41, %v1346_v9  ;;  %v1523_v9 = vld [vmem:[#allocation3 + $0x18] sm:$0xff] }
 0x886   : > { %v1349_v12 = vmul.f32 1.442695, %v1348_v11 }
 0x888   : > { %3257 = vpow2.f32 %v1349_v12 }
 0x892   : > { %v3258_v13 = vpop.eup %3257 }
 0x893   : > { %2640 = vmatmul.mubr.f32.vlgmr.msra.gmra.mrb[20].mxu1 %v3258_v13 }
 0x894   : > { %2992 = vmatpush3.bf16.xpose.msra.mxu1 %v4081_v49  ;;  %2674 = vmatprep.mubr.msk.f32.mxu1 %vm3590_vm1, %v3591_v43  ;;  %v1447_v43 = vld [vmem:[#allocation8 + $0x18] sm:$0xff] }
 0x895   : > { %2993 = vmatprep.subr.bf16.mxu1 %v3589_v42 }
 0x89c   : > { %2995 = vmatpush3.bf16.xpose.msra.mxu1 %v4085_v54 }
 0x89d   : > { %2996 = vmatprep.subr.bf16.mxu1 %v3589_v42 }
 0x8a4   : > { %2998 = vmatpush3.bf16.xpose.msra.mxu1 %v4087_v59 }
 0x8a5   : > { %2999 = vmatprep.subr.bf16.mxu1 %v3589_v42 }
 0x8ac   : > { %3001 = vmatpush3.bf16.xpose.msra.mxu1 %v4091_v0 }
 0x8ad   : > { %3002 = vmatprep.subr.bf16.mxu1 %v3589_v42 }
 0x8b4   : > { %3004 = vmatpush3.bf16.xpose.msra.mxu1 %v4093_v5  ;;  %v966_v5 = vmul.f32 1.442695, %v965_v53 }
 0x8b5   : > { %3005 = vmatprep.subr.bf16.mxu1 %v3589_v42 }
 0x8b6   : > { %3259 = vpow2.f32 %v966_v5 }
 0x8b7   : > { %3261 = vpow2.f32 %v1154_v26  ;;  %v1704_v26 = vld [vmem:[#allocation13 + $0x20] sm:$0xff] (!%p2072_p1) }
 0x8b8   : > { %3263 = vpow2.f32 %v1341_v44  ;;  %v1705_v44 = vld [vmem:[#allocation13 + $0x28] sm:$0xff] (!%p2072_p1) }
 0x8bc   : > { %3007 = vmatpush3.bf16.xpose.msra.mxu1 %v4097_v10 }
 0x8bd   : > { %3008 = vmatprep.subr.bf16.mxu1 %v3589_v42 }
 0x8c0   : > { %v3260_v10 = vpop.eup %3259 }
 0x8c1   : > { %v2061_v14 = vadd.f32 -1.0, %v3260_v10  ;;  %v3262_v45 = vpop.eup %3261 }
 0x8c2   : > { %v1164_v47 = vmul.f32 %v3262_v45, %v1149_v46  ;;  %v2064_v51 = vadd.f32 -1.0, %v3262_v45  ;;  %v3264_v52 = vpop.eup %3263  ;;  %v3045_v45 = vpack.c.bf16 (!%p2072_p1), %v1705_v44, %v1704_v26  ;;  %v1706_v46 = vld [vmem:[#allocation13 + $0x30] sm:$0xff] (!%p2072_p1) }
 0x8c3   : > { %v2067_v53 = vadd.f32 -1.0, %v3264_v52  ;;  %v1351_v6 = vmul.f32 %v3264_v52, %v1336_v4  ;;  %v3596_v52 = vmov (!%p2072_p1), 0.0   ;;  %v1806_v4 = vld [vmem:[#allocation14 + $0x58] sm:$0xff] (!%p2072_p1) }
 0x8c4   : > { %3010 = vmatpush3.bf16.xpose.msra.mxu1 %v4099_v15 }
 0x8c5   : > { %3011 = vmatprep.subr.bf16.mxu1 %v3589_v42  ;;  %v1521_v42 = vld [vmem:[#allocation2 + $0x18] sm:$0xff] }
 0x8cc   : > { %3013 = vmatpush3.bf16.xpose.msra.mxu1 %v4103_v20 }
 0x8d3   : > { %2675 = vmatmul.mubr.f32.vlgmr.msra.gmra.mrb[22].mxu1 %v1447_v43 }
 0x8d4   : > { %2779 = vmatprep.mubr.msk.f32.mxu1 (!%p2072_p1), %vm3595_vm3, %v3596_v52 }
 0x966   : > { %v4325_v49 = vpop.f32.mrb[20].mxu1 }
 0x967   : > { %v2641_v54 = vpop.f32.mrb[21].mxu1  ;;  %v1443_v40 = vmul.f32 %v2068_v32, %v4325_v49 }
 0x9a6   : > { %v1516_v59 = vpop.f32.mrb[22].mxu1 }
 0x9a7   : > { %1524 = vmax.xlane.f32.xlu0 %v1516_v59  ;;  %v2676_v0 = vpop.f32.mrb[23].mxu1 }
 0x9bd   : > { %1057 = vperm.xlu0 %3251, %v2061_v14  }
 0x9dc   : > { %1165 = vadd.xlane.f32.xlu0 %v4267_v38 }
 0xa34   : > { %v1525_v15 = vpop.xlane.xlu0 %1524 }
 0xa35   : > { %v1526_v20 = vmax.f32 %v1521_v42, %v1525_v15 }
 0xa37   : > { %v1527_v16 = vsub.f32 %v1521_v42, %v1526_v20  ;;  %1543 = vst.msk [vmem:[#allocation2 + $0x18] sm:$0xff] %vm980_vm2, %v1526_v20  ;;  %1532 = vperm.xlu1 %3252, %v1526_v20   ;;  %v3593_v20 = vmov (!%p2072_p1), 0  }
 0xa39   : > { %v1528_v60 = vmul.f32 1.442695, %v1527_v16  ;;  %v1700_v16 = vld [vmem:[#allocation13] sm:$0xff] (!%p2072_p1) }
 0xa3c   : > { %v1058_v18 = vpop.permute.xlu0 %1057 }
 0xa3d   : > { %v1066_v19 = vmul.f32 %v2062_v17, %v1058_v18  ;;  %v1701_v17 = vld [vmem:[#allocation13 + $0x8] sm:$0xff] (!%p2072_p1) }
 0xa3e   : > { %v3039_v18 = vpack.c.bf16 (!%p2072_p1), %v1701_v17, %v1700_v16 }
 0xa3f   : > { %v1067_v22 = vadd.f32 1.0, %v1066_v19  ;;  %v1702_v19 = vld [vmem:[#allocation13 + $0x10] sm:$0xff] (!%p2072_p1) }
 0xa41   : > { %v1068_v24 = vmul.f32 %v1067_v22, %v1053_v21  ;;  %v1703_v21 = vld [vmem:[#allocation13 + $0x18] sm:$0xff] (!%p2072_p1) }
 0xa43   : > { %v1070_v25 = vadd.f32 %v1069_v23, %v1068_v24  ;;  %v3594_v24 = vmov (!%p2072_p1), 0.0|0.0  }
 0xa44   : > { %3038 = vmatprep.subr.bf16.mxu0 (!%p2072_p1), %v3594_v24  ;;  %3062 = vmatprep.subr.bf16.mxu1 (!%p2072_p1), %v3594_v24 }
 0xa5b   : > { %977 = vadd.xlane.f32.xlu1 %v4216_v63  ;;  %v961_v63 = vld [vmem:[#allocation3] sm:$0xff] }
 0xa5c   : > { %v976_v1 = vmul.f32 %v3260_v10, %v961_v63  ;;  %v1715_v63 = vld [vmem:[#allocation13 + $0x78] sm:$0xff] (!%p2072_p1) }
 0xa69   : > { %v1166_v48 = vpop.xlane.xlu0 %1165 }
 0xa6a   : > { %v1167_v50 = vadd.f32 %v1166_v48, %v1164_v47  ;;  %v1707_v47 = vld [vmem:[#allocation13 + $0x38] sm:$0xff] (!%p2072_p1) }
 0xa6b   : > { %v3048_v48 = vpack.c.bf16 (!%p2072_p1), %v1707_v47, %v1706_v46  ;;  %v2081_v46 = vld [vmem:[%s4529_s5] ss:$0 sm:$0xff] (!%p2072_p1) }
 0xa6c   : > { %1168 = vst.msk [vmem:[#allocation3 + $0x8] sm:$0xff] %vm980_vm2, %v1167_v50  ;;  %1244 = vperm.xlu1 %3252, %v2064_v51   ;;  %v1708_v50 = vld [vmem:[#allocation13 + $0x40] sm:$0xff] (!%p2072_p1)  ;;  %v1709_v51 = vld [vmem:[#allocation13 + $0x48] sm:$0xff] (!%p2072_p1) }
 0xa70   : > { %1431 = vperm.xlu1 %3252, %v2067_v53   ;;  %v3051_v53 = vpack.c.bf16 (!%p2072_p1), %v1709_v51, %v1708_v50 }
 0xa73   : > { %v1652_v23 = vld [vmem:[#allocation3 + $0x8] sm:$0xff] (!%p2072_p1) }
 0xa74   : > { %3270 = vset.pattern.permute.xlu1 (!%p2072_p1), %v3593_v20 }
 0xa94   : > { %1352 = vadd.xlane.f32.xlu1 %v3258_v13 }
 0xab6   : > { %v1533_v55 = vpop.permute.xlu1 %1532 }
 0xab7   : > { %v1535_v56 = vsub.f32 %v1516_v59, %v1533_v55  ;;  %v1710_v55 = vld [vmem:[#allocation13 + $0x50] sm:$0xff] (!%p2072_p1) }
 0xab9   : > { %v1536_v57 = vmul.f32 1.442695, %v1535_v56  ;;  %v1711_v56 = vld [vmem:[#allocation13 + $0x58] sm:$0xff] (!%p2072_p1) }
 0xabb   : > { %3265 = vpow2.f32 %v1536_v57  ;;  %v3054_v57 = vpack.c.bf16 (!%p2072_p1), %v1711_v56, %v1710_v55 }
 0xabc   : > { %3267 = vpow2.f32 %v1528_v60  ;;  %v1713_v60 = vld [vmem:[#allocation13 + $0x68] sm:$0xff] (!%p2072_p1) }
 0xac5   : > { %v3266_v58 = vpop.eup %3265 }
 0xac6   : > { %1539 = vadd.xlane.f32.xlu0 %v3266_v58  ;;  %2710 = vmatmul.mubr.f32.vlgmr.msra.gmra.mrb[22].mxu0 %v3266_v58  ;;  %v3268_v61 = vpop.eup %3267  ;;  %v1712_v58 = vld [vmem:[#allocation13 + $0x60] sm:$0xff] (!%p2072_p1) }
 0xac7   : > { %v2070_v62 = vadd.f32 -1.0, %v3268_v61  ;;  %v1538_v11 = vmul.f32 %v3268_v61, %v1523_v9  ;;  %3040 = vmatpush3.bf16.msra.mxu0 (!%p2072_p1), %v3039_v18  ;;  %2744 = vmatprep.mubr.msk.f32.mxu0 (!%p2072_p1), %vm3595_vm3, %v3596_v52  ;;  %v3057_v61 = vpack.c.bf16 (!%p2072_p1), %v1713_v60, %v1712_v58 }
 0xac8   : > { %3041 = vmatprep.subr.bf16.mxu0 (!%p2072_p1), %v3594_v24 }
 0xadc   : > { %1618 = vperm.xlu0 %3251, %v2070_v62   ;;  %v1714_v62 = vld [vmem:[#allocation13 + $0x70] sm:$0xff] (!%p2072_p1) }
 0xae0   : > { %3269 = vset.pattern.permute.xlu0 (!%p2072_p1), %v3593_v20 }
 0xae8   : > { %v978_v2 = vpop.xlane.xlu1 %977 }
 0xae9   : > { %v979_v27 = vadd.f32 %v978_v2, %v976_v1  ;;  %v1795_v1 = vld [vmem:[#allocation14] sm:$0xff] (!%p2072_p1)  ;;  %v1796_v2 = vld [vmem:[#allocation14 + $0x8] sm:$0xff] (!%p2072_p1) }
 0xaeb   : > { %981 = vst.msk [vmem:[#allocation3] sm:$0xff] %vm980_vm2, %v979_v27  ;;  %v1797_v27 = vld [vmem:[#allocation14 + $0x10] sm:$0xff] (!%p2072_p1) }
 0xaec   : > { %v1245_v29 = vpop.permute.xlu1 %1244 }
 0xaed   : > { %v1253_v30 = vmul.f32 %v2065_v28, %v1245_v29  ;;  %v3060_v28 = vpack.c.bf16 (!%p2072_p1), %v1715_v63, %v1714_v62  ;;  %v3063_v29 = vpack.c.bf16 (!%p2072_p1), %v1796_v2, %v1795_v1 }
 0xaef   : > { %v1254_v31 = vadd.f32 1.0, %v1253_v30  ;;  %v1798_v30 = vld [vmem:[#allocation14 + $0x18] sm:$0xff] (!%p2072_p1)  ;;  %3064 = vmatpush3.bf16.msra.mxu1 (!%p2072_p1), %v3063_v29 }
 0xaf0   : > { %v1432_v33 = vpop.permute.xlu1 %1431  ;;  %3065 = vmatprep.subr.bf16.mxu1 (!%p2072_p1), %v3594_v24 }
 0xaf1   : > { %v1255_v36 = vmul.f32 %v1254_v31, %v1070_v25  ;;  %v1440_v37 = vmul.f32 %v2068_v32, %v1432_v33  ;;  %v3042_v25 = vpack.c.bf16 (!%p2072_p1), %v1703_v21, %v1702_v19  ;;  %v3066_v31 = vpack.c.bf16 (!%p2072_p1), %v1798_v30, %v1797_v27  ;;  %v1799_v32 = vld [vmem:[#allocation14 + $0x20] sm:$0xff] (!%p2072_p1)  ;;  %v1800_v33 = vld [vmem:[#allocation14 + $0x28] sm:$0xff] (!%p2072_p1)  ;;  %v1809_v19 = vld [vmem:[#allocation14 + $0x70] sm:$0xff] (!%p2072_p1) }
 0xaf2   : > { %v1637_v15 = vld [vmem:[#allocation3] sm:$0xff] (!%p2072_p1) }
 0xaf3   : > { %v1257_v38 = vadd.f32 %v1256_v34, %v1255_v36  ;;  %v1441_v39 = vadd.f32 1.0, %v1440_v37  ;;  %1641 = vperm.xlu0 (!%p2072_p1), %3269, %v1637_v15   ;;  %3043 = vmatpush3.bf16.msra.mxu0 (!%p2072_p1), %v3042_v25  ;;  %v3069_v34 = vpack.c.bf16 (!%p2072_p1), %v1800_v33, %v1799_v32  ;;  %v1801_v36 = vld [vmem:[#allocation14 + $0x30] sm:$0xff] (!%p2072_p1)  ;;  %v1802_v37 = vld [vmem:[#allocation14 + $0x38] sm:$0xff] (!%p2072_p1) }
 0xaf4   : > { %3044 = vmatprep.subr.bf16.mxu0 (!%p2072_p1), %v3594_v24  ;;  %3067 = vmatpush3.bf16.msra.mxu1 (!%p2072_p1), %v3066_v31  ;;  %v1810_v21 = vld [vmem:[#allocation14 + $0x78] sm:$0xff] (!%p2072_p1) }
 0xaf5   : > { %v1442_v41 = vmul.f32 %v1441_v39, %v1257_v38  ;;  %3068 = vmatprep.subr.bf16.mxu1 (!%p2072_p1), %v3594_v24  ;;  %v3072_v38 = vpack.c.bf16 (!%p2072_p1), %v1802_v37, %v1801_v36  ;;  %v1803_v39 = vld [vmem:[#allocation14 + $0x40] sm:$0xff] (!%p2072_p1) }
 0xaf7   : > { %v1444_v3 = vadd.f32 %v1443_v40, %v1442_v41  ;;  %1656 = vperm.xlu0 (!%p2072_p1), %3269, %v1652_v23   ;;  %3046 = vmatpush3.bf16.msra.mxu0 (!%p2072_p1), %v3045_v45  ;;  %v1804_v40 = vld [vmem:[#allocation14 + $0x48] sm:$0xff] (!%p2072_p1)  ;;  %v2080_v23 = vld [vmem:[%s4527_s1] ss:$0 sm:$0xff] (!%p2072_p1) }
 0xaf8   : > { %3047 = vmatprep.subr.bf16.mxu0 (!%p2072_p1), %v3594_v24  ;;  %3070 = vmatpush3.bf16.msra.mxu1 (!%p2072_p1), %v3069_v34  ;;  %v3075_v41 = vpack.c.bf16 (!%p2072_p1), %v1804_v40, %v1803_v39 }
 0xaf9   : > { %3071 = vmatprep.subr.bf16.mxu1 (!%p2072_p1), %v3594_v24 }
 0xafb   : > { %3049 = vmatpush3.bf16.msra.mxu0 (!%p2072_p1), %v3048_v48 }
 0xafc   : > { %3050 = vmatprep.subr.bf16.mxu0 (!%p2072_p1), %v3594_v24  ;;  %3073 = vmatpush3.bf16.msra.mxu1 (!%p2072_p1), %v3072_v38 }
 0xafd   : > { %3074 = vmatprep.subr.bf16.mxu1 (!%p2072_p1), %v3594_v24 }
 0xaff   : > { %3052 = vmatpush3.bf16.msra.mxu0 (!%p2072_p1), %v3051_v53 }
 0xb00   : > { %3053 = vmatprep.subr.bf16.mxu0 (!%p2072_p1), %v3594_v24  ;;  %3076 = vmatpush3.bf16.msra.mxu1 (!%p2072_p1), %v3075_v41 }
 0xb01   : > { %3077 = vmatprep.subr.bf16.mxu1 (!%p2072_p1), %v3594_v24 }
 0xb03   : > { %3055 = vmatpush3.bf16.msra.mxu0 (!%p2072_p1), %v3054_v57 }
 0xb04   : > { %3056 = vmatprep.subr.bf16.mxu0 (!%p2072_p1), %v3594_v24 }
 0xb07   : > { %3058 = vmatpush3.bf16.msra.mxu0 (!%p2072_p1), %v3057_v61 }
 0xb08   : > { %3059 = vmatprep.subr.bf16.mxu0 (!%p2072_p1), %v3594_v24 }
 0xb0b   : > { %3061 = vmatpush3.bf16.msra.mxu0 (!%p2072_p1), %v3060_v28 }
 0xb21   : > { %v1353_v7 = vpop.xlane.xlu1 %1352 }
 0xb22   : > { %v1354_v8 = vadd.f32 %v1353_v7, %v1351_v6  ;;  %v1807_v7 = vld [vmem:[#allocation14 + $0x60] sm:$0xff] (!%p2072_p1) }
 0xb24   : > { %1355 = vst.msk [vmem:[#allocation3 + $0x10] sm:$0xff] %vm980_vm2, %v1354_v8  ;;  %v1808_v8 = vld [vmem:[#allocation14 + $0x68] sm:$0xff] (!%p2072_p1) }
 0xb25   : > { %v3081_v9 = vpack.c.bf16 (!%p2072_p1), %v1808_v8, %v1807_v7 }
 0xb2b   : > { %v1667_v42 = vld [vmem:[#allocation3 + $0x10] sm:$0xff] (!%p2072_p1) }
 0xb2c   : > { %1671 = vperm.xlu1 (!%p2072_p1), %3270, %v1667_v42  }
 0xb53   : > { %v1540_v12 = vpop.xlane.xlu0 %1539 }
 0xb54   : > { %v1541_v13 = vadd.f32 %v1540_v12, %v1538_v11 }
 0xb56   : > { %1542 = vst.msk [vmem:[#allocation3 + $0x18] sm:$0xff] %vm980_vm2, %v1541_v13  ;;  %v2073_v13 = vld [vmem:[%s4526_s3] ss:$0 sm:$0xff] (!%p2072_p1) }
 0xb5b   : > { %v1619_v43 = vpop.permute.xlu0 %1618 }
 0xb5c   : > { %v1627_v49 = vmul.f32 %v2071_v35, %v1619_v43  ;;  %v2077_v43 = vld [vmem:[%s4526_s3 + $0x2] ss:$0 sm:$0xff] (!%p2072_p1) }
 0xb5d   : > { %v1682_v22 = vld [vmem:[#allocation3 + $0x18] sm:$0xff] (!%p2072_p1) }
 0xb5e   : > { %v1628_v54 = vadd.f32 1.0, %v1627_v49  ;;  %1686 = vperm.xlu1 (!%p2072_p1), %3270, %v1682_v22   ;;  %v3084_v22 = vpack.c.bf16 (!%p2072_p1), %v1810_v21, %v1809_v19 }
 0xb60   : > { %v1629_v0 = vmul.f32 %v1628_v54, %v1444_v3  ;;  %v1805_v3 = vld [vmem:[#allocation14 + $0x50] sm:$0xff] (!%p2072_p1) }
 0xb61   : > { %v3078_v6 = vpack.c.bf16 (!%p2072_p1), %v1806_v4, %v1805_v3 }
 0xb63   : > { %3079 = vmatpush3.bf16.msra.mxu1 (!%p2072_p1), %v3078_v6 }
 0xb64   : > { %3080 = vmatprep.subr.bf16.mxu1 (!%p2072_p1), %v3594_v24 }
 0xb67   : > { %3082 = vmatpush3.bf16.msra.mxu1 (!%p2072_p1), %v3081_v9 }
 0xb68   : > { %3083 = vmatprep.subr.bf16.mxu1 (!%p2072_p1), %v3594_v24 }
 0xb6b   : > { %3085 = vmatpush3.bf16.msra.mxu1 (!%p2072_p1), %v3084_v22 }
 0xb72   : > { %v1642_v12 = vpop.permute.xlu0 (!%p2072_p1), %1641 }
 0xb73   : > { %v1650_v54 = vmul.f32 (!%p2072_p1), %v2073_v13, %v1642_v12 }
 0xb76   : > { %v1657_v49 = vpop.permute.xlu0 (!%p2072_p1), %1656 }
 0xb98   : > { %1636 = sbr.rel (%p2072_p1) target bundleno = 3490 (0xda2), region = 100 }
 0xb99   : > { %v1610_v59 = vpop.f32.mrb[22].mxu0 }
 0xb9a   : > { %v1630_v5 = vmul.f32 %v2071_v35, %v1610_v59  ;;  %v2711_v10 = vpop.f32.mrb[23].mxu0  ;;  %v2075_v35 = vld [vmem:[%s4526_s3 + $0x1] ss:$0 sm:$0xff] (!%p2072_p1) }
 0xb9b   : > { %v1665_v59 = vmul.f32 (!%p2072_p1), %v2075_v35, %v1657_v49 }
 0xb9c   : > { %v1631_v14 = vadd.f32 %v1630_v5, %v1629_v0  ;;  %v2079_v0 = vld [vmem:[%s4526_s3 + $0x3] ss:$0 sm:$0xff] (!%p2072_p1)  ;;  %s4528_s3 = sld [smem:[#allocation34_spill]] (!%p2072_p1) }
 0xb9e   : > { %1632 = vst [vmem:[#allocation4] sm:$0xff] %v1631_v14  ;;  %v1666_v14 = vadd.f32 (!%p2072_p1), %v1665_v59, %v1650_v54 }
 0xba2   : > { %v1793_v25 = vld [vmem:[%s4528_s3] sm:$0xff] }
 0xba5   : > { %v1697_v16 = vld [vmem:[#allocation4] sm:$0xff] }
 0xbab   : > { %v1672_v11 = vpop.permute.xlu1 %1671 }
 0xbac   : > { %v1680_v10 = vmul.f32 %v2077_v43, %v1672_v11 }
 0xbae   : > { %v1681_v15 = vadd.f32 %v1680_v10, %v1666_v14 }
 0xbdd   : > { %v1687_v5 = vpop.permute.xlu1 %1686 }
 0xbde   : > { %v1695_v42 = vmul.f32 %v2079_v0, %v1687_v5 }
 0xbe0   : > { %v1696_v20 = vadd.f32 %v1695_v42, %v1681_v15 }
 0xbe2   : > { %3271 = vrcp.f32 %v1696_v20 }
 0xbec   : > { %v3272_v17 = vpop.eup %3271 }
 0xbed   : > { %v1699_v18 = vmul.f32 %v3272_v17, %v1697_v16 }
 0xbef   : > { %2745 = vmatmul.mubr.f32.vlgmr.msra.gmra.mrb[0].mxu0 %v1699_v18 }
 0xcc2   : > { %v1789_v24 = vpop.f32.mrb[0].mxu0 }
 0xcc3   : > { %v1790_v26 = vadd.f32 %v2080_v23, %v1789_v24  ;;  %v2746_v44 = vpop.f32.mrb[1].mxu0 }
 0xcc5   : > { %v1794_v45 = vadd.f32 %v1793_v25, %v1790_v26 }
 0xcc7   : > { %2780 = vmatmul.mubr.f32.vlgmr.msra.gmra.mrb[0].mxu1 %v1794_v45 }
 0xd9a   : > { %v1884_v47 = vpop.f32.mrb[0].mxu1 }
 0xd9b   : > { %v1885_v48 = vadd.f32 %v2081_v46, %v1884_v47  ;;  %v2781_v50 = vpop.f32.mrb[1].mxu1 }
 0xd9d   : > { %v1888_v51 = vmax.f32 %v1885_v48, 0.0 }
 0xd9f   : > { %v1889_v52 = vadd.f32 %v1888_v51, %v1794_v45 }
 0xda1   : > { %1890 = vst [vmem:[%s520_s14] sm:$0xff] %v1889_v52 }
 0xda2 PF: > { %s4530_s28 = sld [smem:[#allocation23_spill]]  ;;  %s4531_s20 = sld [smem:[#allocation36_spill]] }
 0xda3   : > { %s1905_s8 = sshll.u32 %s520_s14, 4  ;;  %s1892_s2 = scalar_lea.sflag [#allocation7], %s518_s7  ;;  %s1906_s8 = int_to_ptr.vmem [resolvable:$true] %s1905_s8 }
 0xda4   : > { %s3443_s3 = scalar_lea.vmem %s1906_s8, 128  ;;  %p4532_p6 = scmp.ne.s32.totalorder %s4511_s24, 0 }
 0xda5   : > { %p3444_p5 = scmp.ne.s32.totalorder %s1906_s8, %s3443_s3  ;;  %s3597_s18 = smov [#allocation16]  }
 0xda6   : > { %s3447_s6 = sshll.u32 %s3597_s18, 4  ;;  %s3448_s6 = int_to_ptr.vmem [resolvable:$false] %s3447_s6 }
 0xda7   : > { %p3445_p12 = pnand %p3444_p5, %p4532_p6  ;;  %s3449_s5 = scalar_lea.vmem %s3448_s6, 256 }
 0xda8   : > { %s2083_s12 = sshll.u32 %s4530_s28, 7  ;;  %p3450_p7 = scmp.lt.s32.totalorder %s1906_s8, %s3448_s6 }
 0xda9   : > { %s4399_s1 = scalar_lea.hbm %s4531_s20, %s2083_s12  ;;  %p3446_p13 = pneg %p3445_p12 }
 0xdaa   : > { %p3451_p3 = scmp.lt.s32.totalorder %s3449_s5, %s3443_s3 }
 0xdac   : > { %p3452_p2 = por %p3451_p3, %p3450_p7 }
 0xdae   : > { %p3453_p8 = pnand %p3452_p2, %p3446_p13 }
 0xdb0   : > { %3456 = shalt.err (!%p3453_p8)
}
 0xdb1   : > { %s3457_s7 = scalar_lea.hbm %s4399_s1, 128  ;;  %s3461_s28 = scalar_lea.hbm %s4531_s20, 256 }
 0xdb2   : > { %p3458_p9 = scmp.ne.s32.totalorder %s4399_s1, %s3457_s7  ;;  %p3462_p11 = scmp.lt.u32.totalorder %s4399_s1, %s4531_s20 }
 0xdb3   : > { %p3463_p4 = scmp.lt.u32.totalorder %s3461_s28, %s3457_s7  ;;  %p3465_p5 = scmp.lt.u32.totalorder %s3457_s7, %s4399_s1 }
 0xdb4   : > { %p3459_p10 = pnand %p3458_p9, %p4532_p6 }
 0xdb5   : > { %p3464_p1 = por %p3463_p4, %p3462_p11 }
 0xdb6   : > { %p3460_p0 = pneg %p3459_p10 }
 0xdb7   : > { %p3466_p12 = por %p3465_p5, %p3464_p1 }
 0xdb9   : > { %p3467_p13 = pnand %p3466_p12, %p3460_p0 }
 0xdbb   : > { %3470 = shalt.err (!%p3467_p13)
}
 0xdbc   : > { %3108 = dma.vmem_to_hbm [thread:$0]  (%p4532_p6), %s1906_s8, 128, %s4399_s1, %s1892_s2  }
 0xdbd PF: > { %p3145_p7 = scmp.ge.s32.totalorder %s3577_s13, 2  ;;  %s1917_s11 = sand.u32 1, %s3537_s21  }
 0xdbe   : > { %p4533_p3 = scmp.ne.s32.totalorder %s4513_s19, 0  ;;  %s1918_s3 = scalar_lea.sflag [#allocation7], %s1917_s11 }
 0xdc0   : > { %p3131_p2 = pnand %p3145_p7, %p4533_p3 }
 0xdc2   : > { %3532 = dma.done.wait (!%p3131_p2), %s1918_s3, 128  }
 0xdc3   : > { %3534 = vsyncadd (!%p3131_p2), %s1918_s3, 4294967168  ;;  %s31_s13 = sadd.s32 1, %s3577_s13   ;;  %s4534_s21 = smov %s3541_s22 }
 0xdc4   : > { %p28_p8 = scmp.ge.s32.totalorder %s31_s13, 6   ;;  %s4535_s22 = smov %s3545_s23 }
 0xdc5   : > { %s4536_s23 = smov %s3920_s27  ;;  %s4537_s24 = smov %s3553_s25 }
 0xdc6   : > { %s4538_s25 = smov %s3557_s26  ;;  %s4539_s26 = smov %s3923_s0 }
 0xdc7   : > { %s4540_s27 = smov %s3569_s29  ;;  %s4541_s28 = smov %s3573_s30 }
 0xdc8   : > { %s4542_s29 = smov %s4545_s16  ;;  %s4543_s30 = smov %s4549_s17 }
 0xdc9   :  { %30 = sbr.rel (!%p28_p8) target bundleno = 25 (0x19), region = 153 }
 0xdd0   :  { %1923 = vsyncpa [#allocation6], 1 }
 0xdd1   :  { %1925 = vsyncpa [#allocation6 + $0x1], 1 }
 0xdd2   :  { %1926 = vsyncpa [#allocation9], 1 }
 0xdd3   :  { %1927 = vsyncpa [#allocation12], 1 }
 0xdd4   :  { %1928 = vsyncpa [#allocation15], 1 }
 0xdd5   :  { %1929 = vsyncpa [#allocation7], 1 }
 0xdd6   :  { %1931 = vsyncpa [#allocation7 + $0x1], 1 }

</bundles_post_ra>
